<compile_context>
chip_gen: v5e
topology: v5e:2x2
jax: 0.10.0
libtpu: 0.0.40
codegen_flags: <defaults>
</compile_context>

<pallas_src>
import numpy as np

import jax
import jax.numpy as jnp
from jax import lax
from jax.experimental import pallas as pl
from jax.experimental.pallas import tpu as pltpu


# ---------------------------------------------------------------------------
# Fused Pallas kernel: conv1 -> relu -> conv2 -> relu -> maxpool -> avgpool -> fc
# ---------------------------------------------------------------------------
def _deep_surv_kernel(cols_ref, w1_ref, g_ref, w2_ref, fcw_ref, fcb_ref, o_ref):
    # conv1 + ReLU: (P1, K1) @ (K1, C1) on the MXU, f32 accumulation.
    # y1 stays resident (a value -> vregs / VMEM spill), never touches HBM.
    y1 = jnp.maximum(
        jnp.dot(cols_ref[...], w1_ref[...], preferred_element_type=jnp.float32),
        0.0,
    ).astype(jnp.bfloat16)                                    # (P1, C1) bf16 MXU operand

    n_taps = g_ref.shape[0]                                   # 9  (3x3 conv2 taps)
    n_rows = g_ref.shape[1]                                   # 4 * n_pool_windows
    c2 = w2_ref.shape[2]

    # conv2 (stride 2) as 9 gather-matmul taps:
    #   y2[k, :] = sum_t (G_t @ y1) @ W2_t
    # G_t is a one-hot bf16 selection matrix that also re-orders the conv2 output
    # rows slot-major for the maxpool below.  Only matmuls -> no strided access.
    acc = jnp.zeros((n_rows, c2), jnp.float32)
    for t in range(n_taps):                                   # unrolled (9 taps)
        sel = jnp.dot(g_ref[t], y1, preferred_element_type=jnp.float32)
        acc = acc + jnp.dot(sel.astype(jnp.bfloat16), w2_ref[t],
                            preferred_element_type=jnp.float32)
    y2 = jnp.maximum(acc, 0.0)                                # (4 * nwin, C2) f32

    # MaxPool2d(2, 2): rows are slot-major, so this is a pure-VPU elementwise max
    # of four contiguous row blocks (no (N,P,4,C) layout, no XLU window reduce).
    nwin = n_rows // 4
    m = jnp.maximum(jnp.maximum(y2[0 * nwin:1 * nwin], y2[1 * nwin:2 * nwin]),
                    jnp.maximum(y2[2 * nwin:3 * nwin], y2[3 * nwin:4 * nwin]))

    # AdaptiveAvgPool2d((1, 1)) + Linear(32, 1), all f32.
    avg = jnp.sum(m, axis=0, keepdims=True) * (1.0 / nwin)    # (1, C2)
    out = jnp.sum(avg * fcw_ref[...], axis=-1, keepdims=True) + fcb_ref[...]
    o_ref[...] = out.astype(o_ref.dtype)                      # (1, 1)


def _fused_pallas(cols1, w1_mat, g, w2_taps, fc_w, fc_b):
    N, P1, K1 = cols1.shape
    T, R, _ = g.shape
    C1 = w1_mat.shape[1]
    C2 = w2_taps.shape[2]
    out = pl.pallas_call(
        _deep_surv_kernel,
        out_shape=jax.ShapeDtypeStruct((N, 1, 1), jnp.float32),
        grid=(N,),
        in_specs=[
            pl.BlockSpec((None, P1, K1), lambda n: (n, 0, 0)),   # conv1 patches (per sample)
            pl.BlockSpec((K1, C1), lambda n: (0, 0)),            # conv1 weight  (fetched once)
            pl.BlockSpec((T, R, P1), lambda n: (0, 0, 0)),       # conv2 gather matrices
            pl.BlockSpec((T, C1, C2), lambda n: (0, 0, 0)),      # conv2 weights (per tap)
            pl.BlockSpec((1, C2), lambda n: (0, 0)),             # fc weight
            pl.BlockSpec((1, 1), lambda n: (0, 0)),              # fc bias
        ],
        out_specs=pl.BlockSpec((None, 1, 1), lambda n: (n, 0, 0)),
        compiler_params=pltpu.CompilerParams(
            dimension_semantics=("parallel",),                   # megacore on v7x
        ),
    )(cols1, w1_mat, g, w2_taps, fc_w, fc_b)
    return out.reshape(N, 1)


# ---------------------------------------------------------------------------
# Wrapper-side glue (layout plumbing only)
# ---------------------------------------------------------------------------
def _im2col(x_nhwc, kh, kw, stride):
    # Patch extraction for conv1 only: one cheap XLA fusion over the raw input.
    N, H, W, C = x_nhwc.shape
    oh = (H - kh) // stride + 1
    ow = (W - kw) // stride + 1
    cols = []
    for i in range(kh):
        for j in range(kw):
            cols.append(x_nhwc[:, i:i + stride * oh:stride,
                               j:j + stride * ow:stride, :])   # (N, oh, ow, C)
    stacked = jnp.stack(cols, axis=3)                          # (N, oh, ow, kh*kw, C)
    return stacked.reshape(N, oh * ow, kh * kw * C), (oh, ow)


def _conv2_pool_gather(oh1, ow1, oh2, ow2, kh, kw, stride):
    """One-hot selection matrices folding conv2's stride-2 patch gather and the
    2x2 maxpool-window regrouping (slot-major row order) into plain matmuls."""
    ph, pw = oh2 // 2, ow2 // 2          # maxpool floor semantics
    nwin = ph * pw
    g = np.zeros((kh * kw, 4 * nwin, oh1 * ow1), np.float32)
    for i in range(kh):
        for j in range(kw):
            t = i * kw + j
            for da in range(2):
                for db in range(2):
                    slot = da * 2 + db
                    for a in range(ph):
                        for b in range(pw):
                            k = slot * nwin + (a * pw + b)     # slot-major row
                            conv2_h = 2 * a + da               # conv2 output pos
                            conv2_w = 2 * b + db
                            r = (stride * conv2_h + i) * ow1 + (stride * conv2_w + j)
                            g[t, k, r] = 1.0
    return jnp.asarray(g, dtype=jnp.bfloat16)                  # exact 0/1 selection


@jax.jit
def deep_surv_forward(x_nchw, params):
    x = jnp.transpose(x_nchw, (0, 2, 3, 1)).astype(jnp.bfloat16)     # NCHW -> NHWC, bf16

    # conv1: Conv2d(3, 32, k=5, s=2, bias=False) -- im2col patches + (75, 32) weight.
    w1 = params["conv1_w"]                                           # (32, 3, 5, 5) OIHW
    c_in, c1 = w1.shape[1], w1.shape[0]
    cols1, (oh1, ow1) = _im2col(x, 5, 5, 2)                          # (N, oh1*ow1, 75) bf16
    w1_mat = jnp.transpose(w1, (2, 3, 1, 0)).reshape(5 * 5 * c_in, c1).astype(jnp.bfloat16)

    # conv2: Conv2d(32, 32, k=3, s=2, bias=False) -- per-tap (ci, co) weights.
    w2 = params["conv2_w"]                                           # (32, 32, 3, 3) OIHW
    c2 = w2.shape[0]
    w2_taps = jnp.transpose(w2, (2, 3, 1, 0)).reshape(3 * 3, c1, c2).astype(jnp.bfloat16)

    oh2, ow2 = (oh1 - 3) // 2 + 1, (ow1 - 3) // 2 + 1
    g = _conv2_pool_gather(oh1, ow1, oh2, ow2, 3, 3, 2)              # (9, 4*nwin, oh1*ow1)

    fc_w = params["fc_w"].astype(jnp.float32)                        # (1, 32)
    fc_b = params["fc_b"].reshape(1, 1).astype(jnp.float32)          # (1, 1)

    return _fused_pallas(cols1, w1_mat, g, w2_taps, fc_w, fc_b)      # (N, 1)


# ---------------------------------------------------------------------------
# Pure-JAX reference (same bf16 MXU operands + f32 accumulation) for verification
# ---------------------------------------------------------------------------
def deep_surv_reference(x_nchw, params):
    dn = ("NCHW", "OIHW", "NCHW")
    y = lax.conv_general_dilated(x_nchw.astype(jnp.bfloat16),
                                 params["conv1_w"].astype(jnp.bfloat16),
                                 (2, 2), "VALID", dimension_numbers=dn,
                                 preferred_element_type=jnp.float32)
    y = jnp.maximum(y, 0.0)
    y = lax.conv_general_dilated(y.astype(jnp.bfloat16),
                                 params["conv2_w"].astype(jnp.bfloat16),
                                 (2, 2), "VALID", dimension_numbers=dn,
                                 preferred_element_type=jnp.float32)
    y = jnp.maximum(y, 0.0)
    y = lax.reduce_window(y, -jnp.inf, lax.max, (1, 1, 2, 2), (1, 1, 2, 2), "VALID")
    y = jnp.mean(y, axis=(2, 3))                                     # (N, 32)
    return y @ params["fc_w"].T + params["fc_b"]                     # (N, 1)


# ---------------------------------------------------------------------------
if __name__ == "__main__":
    key = jax.random.PRNGKey(0)
    kx, k1, k2, k3, k4 = jax.random.split(key, 5)

    x = jax.random.normal(kx, (2, 3, 32, 32), dtype=jnp.float32)

    params = {
        "conv1_w": 0.1 * jax.random.normal(k1, (32, 3, 5, 5), dtype=jnp.float32),
        "conv2_w": 0.1 * jax.random.normal(k2, (32, 32, 3, 3), dtype=jnp.float32),
        "fc_w": 0.1 * jax.random.normal(k3, (1, 32), dtype=jnp.float32),
        "fc_b": 0.1 * jax.random.normal(k4, (1,), dtype=jnp.float32),
    }

    out = jax.block_until_ready(deep_surv_forward(x, params))
    ref = deep_surv_reference(x, params)

    assert out.shape == (2, 1), out.shape
    assert jnp.allclose(out, ref, rtol=2e-3, atol=2e-3), (out, ref)

    print("KERNEL_OK")
</pallas_src>

<mosaic_0001>
module attributes {stable_mosaic.version = 11 : i64} {
  func.func @_deep_surv_kernel(%arg0: i32, %arg1: memref<1x196x75xbf16, #tpu.memory_space<vmem>>, %arg2: memref<75x32xbf16, #tpu.memory_space<vmem>>, %arg3: memref<9x36x196xbf16, #tpu.memory_space<vmem>>, %arg4: memref<9x32x32xbf16, #tpu.memory_space<vmem>>, %arg5: memref<1x32xf32, #tpu.memory_space<vmem>>, %arg6: memref<1x1xf32, #tpu.memory_space<vmem>>, %arg7: memref<1x1x1xf32, #tpu.memory_space<vmem>>) attributes {dimension_semantics = [#tpu.dimension_semantics<parallel>], iteration_bounds = array<i64: 2>, scalar_prefetch = 0 : i64, scratch_operands = 0 : i64, tpu.core_type = #tpu.core_type<tc>, window_params = [{transform_indices = @transform_0, window_bounds = array<i64: 1, 196, 75>}, {pipeline_mode = #tpu.pipeline_mode<synchronous>, transform_indices = @transform_1, window_bounds = array<i64: 75, 32>}, {pipeline_mode = #tpu.pipeline_mode<synchronous>, transform_indices = @transform_2, window_bounds = array<i64: 9, 36, 196>}, {pipeline_mode = #tpu.pipeline_mode<synchronous>, transform_indices = @transform_3, window_bounds = array<i64: 9, 32, 32>}, {pipeline_mode = #tpu.pipeline_mode<synchronous>, transform_indices = @transform_4, window_bounds = array<i64: 1, 32>}, {pipeline_mode = #tpu.pipeline_mode<synchronous>, transform_indices = @transform_5, window_bounds = array<i64: 1, 1>}, {transform_indices = @transform_6, window_bounds = array<i64: 1, 1, 1>}]} {
    %c0 = arith.constant 0 : index
    %c0_0 = arith.constant 0 : index
    %c0_1 = arith.constant 0 : index
    %0 = vector.load %arg1[%c0, %c0_0, %c0_1] : memref<1x196x75xbf16, #tpu.memory_space<vmem>>, vector<1x196x75xbf16>
    %1 = vector.shape_cast %0 : vector<1x196x75xbf16> to vector<196x75xbf16>
    %c0_2 = arith.constant 0 : index
    %c0_3 = arith.constant 0 : index
    %2 = vector.load %arg2[%c0_2, %c0_3] : memref<75x32xbf16, #tpu.memory_space<vmem>>, vector<75x32xbf16>
    %cst = arith.constant dense<0.000000e+00> : vector<196x32xf32>
    %3 = tpu.matmul %1, %2, %cst {dimension_numbers = #tpu.dot_dimension_numbers<[1], [0], [0], [1], [0, 0, 1, 1], [], []>} : vector<196x75xbf16>, vector<75x32xbf16>, vector<196x32xf32> -> vector<196x32xf32>
    %cst_4 = arith.constant 0.000000e+00 : f32
    %4 = vector.broadcast %cst_4 : f32 to vector<196x32xf32>
    %5 = arith.maximumf %3, %4 : vector<196x32xf32>
    %6 = arith.truncf %5 : vector<196x32xf32> to vector<196x32xbf16>
    %cst_5 = arith.constant 0.000000e+00 : f32
    %7 = vector.broadcast %cst_5 : f32 to vector<36x32xf32>
    %c0_6 = arith.constant 0 : index
    %c0_7 = arith.constant 0 : index
    %c0_8 = arith.constant 0 : index
    %8 = vector.load %arg3[%c0_6, %c0_7, %c0_8] : memref<9x36x196xbf16, #tpu.memory_space<vmem>>, vector<1x36x196xbf16>
    %9 = vector.shape_cast %8 : vector<1x36x196xbf16> to vector<36x196xbf16>
    %cst_9 = arith.constant dense<0.000000e+00> : vector<36x32xf32>
    %10 = tpu.matmul %9, %6, %cst_9 {dimension_numbers = #tpu.dot_dimension_numbers<[1], [0], [0], [1], [0, 0, 1, 1], [], []>} : vector<36x196xbf16>, vector<196x32xbf16>, vector<36x32xf32> -> vector<36x32xf32>
    %11 = arith.truncf %10 : vector<36x32xf32> to vector<36x32xbf16>
    %c0_10 = arith.constant 0 : index
    %c0_11 = arith.constant 0 : index
    %c0_12 = arith.constant 0 : index
    %12 = vector.load %arg4[%c0_10, %c0_11, %c0_12] : memref<9x32x32xbf16, #tpu.memory_space<vmem>>, vector<1x32x32xbf16>
    %13 = vector.shape_cast %12 : vector<1x32x32xbf16> to vector<32x32xbf16>
    %cst_13 = arith.constant dense<0.000000e+00> : vector<36x32xf32>
    %14 = tpu.matmul %11, %13, %cst_13 {dimension_numbers = #tpu.dot_dimension_numbers<[1], [0], [0], [1], [0, 0, 1, 1], [], []>} : vector<36x32xbf16>, vector<32x32xbf16>, vector<36x32xf32> -> vector<36x32xf32>
    %15 = arith.addf %7, %14 : vector<36x32xf32>
    %c1 = arith.constant 1 : index
    %c0_14 = arith.constant 0 : index
    %c0_15 = arith.constant 0 : index
    %16 = vector.load %arg3[%c1, %c0_14, %c0_15] : memref<9x36x196xbf16, #tpu.memory_space<vmem>>, vector<1x36x196xbf16>
    %17 = vector.shape_cast %16 : vector<1x36x196xbf16> to vector<36x196xbf16>
    %cst_16 = arith.constant dense<0.000000e+00> : vector<36x32xf32>
    %18 = tpu.matmul %17, %6, %cst_16 {dimension_numbers = #tpu.dot_dimension_numbers<[1], [0], [0], [1], [0, 0, 1, 1], [], []>} : vector<36x196xbf16>, vector<196x32xbf16>, vector<36x32xf32> -> vector<36x32xf32>
    %19 = arith.truncf %18 : vector<36x32xf32> to vector<36x32xbf16>
    %c1_17 = arith.constant 1 : index
    %c0_18 = arith.constant 0 : index
    %c0_19 = arith.constant 0 : index
    %20 = vector.load %arg4[%c1_17, %c0_18, %c0_19] : memref<9x32x32xbf16, #tpu.memory_space<vmem>>, vector<1x32x32xbf16>
    %21 = vector.shape_cast %20 : vector<1x32x32xbf16> to vector<32x32xbf16>
    %cst_20 = arith.constant dense<0.000000e+00> : vector<36x32xf32>
    %22 = tpu.matmul %19, %21, %cst_20 {dimension_numbers = #tpu.dot_dimension_numbers<[1], [0], [0], [1], [0, 0, 1, 1], [], []>} : vector<36x32xbf16>, vector<32x32xbf16>, vector<36x32xf32> -> vector<36x32xf32>
    %23 = arith.addf %15, %22 : vector<36x32xf32>
    %c2 = arith.constant 2 : index
    %c0_21 = arith.constant 0 : index
    %c0_22 = arith.constant 0 : index
    %24 = vector.load %arg3[%c2, %c0_21, %c0_22] : memref<9x36x196xbf16, #tpu.memory_space<vmem>>, vector<1x36x196xbf16>
    %25 = vector.shape_cast %24 : vector<1x36x196xbf16> to vector<36x196xbf16>
    %cst_23 = arith.constant dense<0.000000e+00> : vector<36x32xf32>
    %26 = tpu.matmul %25, %6, %cst_23 {dimension_numbers = #tpu.dot_dimension_numbers<[1], [0], [0], [1], [0, 0, 1, 1], [], []>} : vector<36x196xbf16>, vector<196x32xbf16>, vector<36x32xf32> -> vector<36x32xf32>
    %27 = arith.truncf %26 : vector<36x32xf32> to vector<36x32xbf16>
    %c2_24 = arith.constant 2 : index
    %c0_25 = arith.constant 0 : index
    %c0_26 = arith.constant 0 : index
    %28 = vector.load %arg4[%c2_24, %c0_25, %c0_26] : memref<9x32x32xbf16, #tpu.memory_space<vmem>>, vector<1x32x32xbf16>
    %29 = vector.shape_cast %28 : vector<1x32x32xbf16> to vector<32x32xbf16>
    %cst_27 = arith.constant dense<0.000000e+00> : vector<36x32xf32>
    %30 = tpu.matmul %27, %29, %cst_27 {dimension_numbers = #tpu.dot_dimension_numbers<[1], [0], [0], [1], [0, 0, 1, 1], [], []>} : vector<36x32xbf16>, vector<32x32xbf16>, vector<36x32xf32> -> vector<36x32xf32>
    %31 = arith.addf %23, %30 : vector<36x32xf32>
    %c3 = arith.constant 3 : index
    %c0_28 = arith.constant 0 : index
    %c0_29 = arith.constant 0 : index
    %32 = vector.load %arg3[%c3, %c0_28, %c0_29] : memref<9x36x196xbf16, #tpu.memory_space<vmem>>, vector<1x36x196xbf16>
    %33 = vector.shape_cast %32 : vector<1x36x196xbf16> to vector<36x196xbf16>
    %cst_30 = arith.constant dense<0.000000e+00> : vector<36x32xf32>
    %34 = tpu.matmul %33, %6, %cst_30 {dimension_numbers = #tpu.dot_dimension_numbers<[1], [0], [0], [1], [0, 0, 1, 1], [], []>} : vector<36x196xbf16>, vector<196x32xbf16>, vector<36x32xf32> -> vector<36x32xf32>
    %35 = arith.truncf %34 : vector<36x32xf32> to vector<36x32xbf16>
    %c3_31 = arith.constant 3 : index
    %c0_32 = arith.constant 0 : index
    %c0_33 = arith.constant 0 : index
    %36 = vector.load %arg4[%c3_31, %c0_32, %c0_33] : memref<9x32x32xbf16, #tpu.memory_space<vmem>>, vector<1x32x32xbf16>
    %37 = vector.shape_cast %36 : vector<1x32x32xbf16> to vector<32x32xbf16>
    %cst_34 = arith.constant dense<0.000000e+00> : vector<36x32xf32>
    %38 = tpu.matmul %35, %37, %cst_34 {dimension_numbers = #tpu.dot_dimension_numbers<[1], [0], [0], [1], [0, 0, 1, 1], [], []>} : vector<36x32xbf16>, vector<32x32xbf16>, vector<36x32xf32> -> vector<36x32xf32>
    %39 = arith.addf %31, %38 : vector<36x32xf32>
    %c4 = arith.constant 4 : index
    %c0_35 = arith.constant 0 : index
    %c0_36 = arith.constant 0 : index
    %40 = vector.load %arg3[%c4, %c0_35, %c0_36] : memref<9x36x196xbf16, #tpu.memory_space<vmem>>, vector<1x36x196xbf16>
    %41 = vector.shape_cast %40 : vector<1x36x196xbf16> to vector<36x196xbf16>
    %cst_37 = arith.constant dense<0.000000e+00> : vector<36x32xf32>
    %42 = tpu.matmul %41, %6, %cst_37 {dimension_numbers = #tpu.dot_dimension_numbers<[1], [0], [0], [1], [0, 0, 1, 1], [], []>} : vector<36x196xbf16>, vector<196x32xbf16>, vector<36x32xf32> -> vector<36x32xf32>
    %43 = arith.truncf %42 : vector<36x32xf32> to vector<36x32xbf16>
    %c4_38 = arith.constant 4 : index
    %c0_39 = arith.constant 0 : index
    %c0_40 = arith.constant 0 : index
    %44 = vector.load %arg4[%c4_38, %c0_39, %c0_40] : memref<9x32x32xbf16, #tpu.memory_space<vmem>>, vector<1x32x32xbf16>
    %45 = vector.shape_cast %44 : vector<1x32x32xbf16> to vector<32x32xbf16>
    %cst_41 = arith.constant dense<0.000000e+00> : vector<36x32xf32>
    %46 = tpu.matmul %43, %45, %cst_41 {dimension_numbers = #tpu.dot_dimension_numbers<[1], [0], [0], [1], [0, 0, 1, 1], [], []>} : vector<36x32xbf16>, vector<32x32xbf16>, vector<36x32xf32> -> vector<36x32xf32>
    %47 = arith.addf %39, %46 : vector<36x32xf32>
    %c5 = arith.constant 5 : index
    %c0_42 = arith.constant 0 : index
    %c0_43 = arith.constant 0 : index
    %48 = vector.load %arg3[%c5, %c0_42, %c0_43] : memref<9x36x196xbf16, #tpu.memory_space<vmem>>, vector<1x36x196xbf16>
    %49 = vector.shape_cast %48 : vector<1x36x196xbf16> to vector<36x196xbf16>
    %cst_44 = arith.constant dense<0.000000e+00> : vector<36x32xf32>
    %50 = tpu.matmul %49, %6, %cst_44 {dimension_numbers = #tpu.dot_dimension_numbers<[1], [0], [0], [1], [0, 0, 1, 1], [], []>} : vector<36x196xbf16>, vector<196x32xbf16>, vector<36x32xf32> -> vector<36x32xf32>
    %51 = arith.truncf %50 : vector<36x32xf32> to vector<36x32xbf16>
    %c5_45 = arith.constant 5 : index
    %c0_46 = arith.constant 0 : index
    %c0_47 = arith.constant 0 : index
    %52 = vector.load %arg4[%c5_45, %c0_46, %c0_47] : memref<9x32x32xbf16, #tpu.memory_space<vmem>>, vector<1x32x32xbf16>
    %53 = vector.shape_cast %52 : vector<1x32x32xbf16> to vector<32x32xbf16>
    %cst_48 = arith.constant dense<0.000000e+00> : vector<36x32xf32>
    %54 = tpu.matmul %51, %53, %cst_48 {dimension_numbers = #tpu.dot_dimension_numbers<[1], [0], [0], [1], [0, 0, 1, 1], [], []>} : vector<36x32xbf16>, vector<32x32xbf16>, vector<36x32xf32> -> vector<36x32xf32>
    %55 = arith.addf %47, %54 : vector<36x32xf32>
    %c6 = arith.constant 6 : index
    %c0_49 = arith.constant 0 : index
    %c0_50 = arith.constant 0 : index
    %56 = vector.load %arg3[%c6, %c0_49, %c0_50] : memref<9x36x196xbf16, #tpu.memory_space<vmem>>, vector<1x36x196xbf16>
    %57 = vector.shape_cast %56 : vector<1x36x196xbf16> to vector<36x196xbf16>
    %cst_51 = arith.constant dense<0.000000e+00> : vector<36x32xf32>
    %58 = tpu.matmul %57, %6, %cst_51 {dimension_numbers = #tpu.dot_dimension_numbers<[1], [0], [0], [1], [0, 0, 1, 1], [], []>} : vector<36x196xbf16>, vector<196x32xbf16>, vector<36x32xf32> -> vector<36x32xf32>
    %59 = arith.truncf %58 : vector<36x32xf32> to vector<36x32xbf16>
    %c6_52 = arith.constant 6 : index
    %c0_53 = arith.constant 0 : index
    %c0_54 = arith.constant 0 : index
    %60 = vector.load %arg4[%c6_52, %c0_53, %c0_54] : memref<9x32x32xbf16, #tpu.memory_space<vmem>>, vector<1x32x32xbf16>
    %61 = vector.shape_cast %60 : vector<1x32x32xbf16> to vector<32x32xbf16>
    %cst_55 = arith.constant dense<0.000000e+00> : vector<36x32xf32>
    %62 = tpu.matmul %59, %61, %cst_55 {dimension_numbers = #tpu.dot_dimension_numbers<[1], [0], [0], [1], [0, 0, 1, 1], [], []>} : vector<36x32xbf16>, vector<32x32xbf16>, vector<36x32xf32> -> vector<36x32xf32>
    %63 = arith.addf %55, %62 : vector<36x32xf32>
    %c7 = arith.constant 7 : index
    %c0_56 = arith.constant 0 : index
    %c0_57 = arith.constant 0 : index
    %64 = vector.load %arg3[%c7, %c0_56, %c0_57] : memref<9x36x196xbf16, #tpu.memory_space<vmem>>, vector<1x36x196xbf16>
    %65 = vector.shape_cast %64 : vector<1x36x196xbf16> to vector<36x196xbf16>
    %cst_58 = arith.constant dense<0.000000e+00> : vector<36x32xf32>
    %66 = tpu.matmul %65, %6, %cst_58 {dimension_numbers = #tpu.dot_dimension_numbers<[1], [0], [0], [1], [0, 0, 1, 1], [], []>} : vector<36x196xbf16>, vector<196x32xbf16>, vector<36x32xf32> -> vector<36x32xf32>
    %67 = arith.truncf %66 : vector<36x32xf32> to vector<36x32xbf16>
    %c7_59 = arith.constant 7 : index
    %c0_60 = arith.constant 0 : index
    %c0_61 = arith.constant 0 : index
    %68 = vector.load %arg4[%c7_59, %c0_60, %c0_61] : memref<9x32x32xbf16, #tpu.memory_space<vmem>>, vector<1x32x32xbf16>
    %69 = vector.shape_cast %68 : vector<1x32x32xbf16> to vector<32x32xbf16>
    %cst_62 = arith.constant dense<0.000000e+00> : vector<36x32xf32>
    %70 = tpu.matmul %67, %69, %cst_62 {dimension_numbers = #tpu.dot_dimension_numbers<[1], [0], [0], [1], [0, 0, 1, 1], [], []>} : vector<36x32xbf16>, vector<32x32xbf16>, vector<36x32xf32> -> vector<36x32xf32>
    %71 = arith.addf %63, %70 : vector<36x32xf32>
    %c8 = arith.constant 8 : index
    %c0_63 = arith.constant 0 : index
    %c0_64 = arith.constant 0 : index
    %72 = vector.load %arg3[%c8, %c0_63, %c0_64] : memref<9x36x196xbf16, #tpu.memory_space<vmem>>, vector<1x36x196xbf16>
    %73 = vector.shape_cast %72 : vector<1x36x196xbf16> to vector<36x196xbf16>
    %cst_65 = arith.constant dense<0.000000e+00> : vector<36x32xf32>
    %74 = tpu.matmul %73, %6, %cst_65 {dimension_numbers = #tpu.dot_dimension_numbers<[1], [0], [0], [1], [0, 0, 1, 1], [], []>} : vector<36x196xbf16>, vector<196x32xbf16>, vector<36x32xf32> -> vector<36x32xf32>
    %75 = arith.truncf %74 : vector<36x32xf32> to vector<36x32xbf16>
    %c8_66 = arith.constant 8 : index
    %c0_67 = arith.constant 0 : index
    %c0_68 = arith.constant 0 : index
    %76 = vector.load %arg4[%c8_66, %c0_67, %c0_68] : memref<9x32x32xbf16, #tpu.memory_space<vmem>>, vector<1x32x32xbf16>
    %77 = vector.shape_cast %76 : vector<1x32x32xbf16> to vector<32x32xbf16>
    %cst_69 = arith.constant dense<0.000000e+00> : vector<36x32xf32>
    %78 = tpu.matmul %75, %77, %cst_69 {dimension_numbers = #tpu.dot_dimension_numbers<[1], [0], [0], [1], [0, 0, 1, 1], [], []>} : vector<36x32xbf16>, vector<32x32xbf16>, vector<36x32xf32> -> vector<36x32xf32>
    %79 = arith.addf %71, %78 : vector<36x32xf32>
    %cst_70 = arith.constant 0.000000e+00 : f32
    %80 = vector.broadcast %cst_70 : f32 to vector<36x32xf32>
    %81 = arith.maximumf %79, %80 : vector<36x32xf32>
    %82 = vector.extract_strided_slice %81 {offsets = [0, 0], sizes = [9, 32], strides = [1, 1]} : vector<36x32xf32> to vector<9x32xf32>
    %83 = vector.extract_strided_slice %81 {offsets = [9, 0], sizes = [9, 32], strides = [1, 1]} : vector<36x32xf32> to vector<9x32xf32>
    %84 = arith.maximumf %82, %83 : vector<9x32xf32>
    %85 = vector.extract_strided_slice %81 {offsets = [18, 0], sizes = [9, 32], strides = [1, 1]} : vector<36x32xf32> to vector<9x32xf32>
    %86 = vector.extract_strided_slice %81 {offsets = [27, 0], sizes = [9, 32], strides = [1, 1]} : vector<36x32xf32> to vector<9x32xf32>
    %87 = arith.maximumf %85, %86 : vector<9x32xf32>
    %88 = arith.maximumf %84, %87 : vector<9x32xf32>
    %cst_71 = arith.constant dense<0.000000e+00> : vector<32xf32>
    %89 = vector.multi_reduction <add>, %88, %cst_71 [0] : vector<9x32xf32> to vector<32xf32>
    %90 = vector.shape_cast %89 : vector<32xf32> to vector<1x32xf32>
    %cst_72 = arith.constant 0.111111112 : f32
    %91 = vector.broadcast %cst_72 : f32 to vector<1x32xf32>
    %92 = arith.mulf %90, %91 : vector<1x32xf32>
    %c0_73 = arith.constant 0 : index
    %c0_74 = arith.constant 0 : index
    %93 = vector.load %arg5[%c0_73, %c0_74] : memref<1x32xf32, #tpu.memory_space<vmem>>, vector<1x32xf32>
    %94 = arith.mulf %92, %93 : vector<1x32xf32>
    %cst_75 = arith.constant dense<0.000000e+00> : vector<1xf32>
    %95 = vector.multi_reduction <add>, %94, %cst_75 [1] : vector<1x32xf32> to vector<1xf32>
    %96 = vector.shape_cast %95 : vector<1xf32> to vector<1x1xf32>
    %c0_76 = arith.constant 0 : index
    %c0_77 = arith.constant 0 : index
    %97 = vector.load %arg6[%c0_76, %c0_77] : memref<1x1xf32, #tpu.memory_space<vmem>>, vector<1x1xf32>
    %98 = arith.addf %96, %97 : vector<1x1xf32>
    %c0_78 = arith.constant 0 : index
    %c0_79 = arith.constant 0 : index
    %c0_80 = arith.constant 0 : index
    %99 = vector.load %arg7[%c0_78, %c0_79, %c0_80] : memref<1x1x1xf32, #tpu.memory_space<vmem>>, vector<1x1x1xf32>
    %100 = vector.shape_cast %99 : vector<1x1x1xf32> to vector<1x1xf32>
    %101 = vector.shape_cast %98 : vector<1x1xf32> to vector<1x1x1xf32>
    tpu.vector_store %arg7[%c0_78, %c0_79, %c0_80], %101 {strides = array<i32>} : memref<1x1x1xf32, #tpu.memory_space<vmem>>, vector<1x1x1xf32>,
    return
  }
  func.func @transform_0(%arg0: i32) -> (i32, i32, i32) {
    %c0_i32 = arith.constant 0 : i32
    %c0_i32_0 = arith.constant 0 : i32
    %c0_i32_1 = arith.constant 0 : i32
    return %arg0, %c0_i32, %c0_i32_0 : i32, i32, i32
  }
  func.func @transform_1(%arg0: i32) -> (i32, i32) {
    %c0_i32 = arith.constant 0 : i32
    %c0_i32_0 = arith.constant 0 : i32
    %c0_i32_1 = arith.constant 0 : i32
    return %c0_i32, %c0_i32_0 : i32, i32
  }
  func.func @transform_2(%arg0: i32) -> (i32, i32, i32) {
    %c0_i32 = arith.constant 0 : i32
    %c0_i32_0 = arith.constant 0 : i32
    %c0_i32_1 = arith.constant 0 : i32
    %c0_i32_2 = arith.constant 0 : i32
    return %c0_i32, %c0_i32_0, %c0_i32_1 : i32, i32, i32
  }
  func.func @transform_3(%arg0: i32) -> (i32, i32, i32) {
    %c0_i32 = arith.constant 0 : i32
    %c0_i32_0 = arith.constant 0 : i32
    %c0_i32_1 = arith.constant 0 : i32
    %c0_i32_2 = arith.constant 0 : i32
    return %c0_i32, %c0_i32_0, %c0_i32_1 : i32, i32, i32
  }
  func.func @transform_4(%arg0: i32) -> (i32, i32) {
    %c0_i32 = arith.constant 0 : i32
    %c0_i32_0 = arith.constant 0 : i32
    %c0_i32_1 = arith.constant 0 : i32
    return %c0_i32, %c0_i32_0 : i32, i32
  }
  func.func @transform_5(%arg0: i32) -> (i32, i32) {
    %c0_i32 = arith.constant 0 : i32
    %c0_i32_0 = arith.constant 0 : i32
    %c0_i32_1 = arith.constant 0 : i32
    return %c0_i32, %c0_i32_0 : i32, i32
  }
  func.func @transform_6(%arg0: i32) -> (i32, i32, i32) {
    %c0_i32 = arith.constant 0 : i32
    %c0_i32_0 = arith.constant 0 : i32
    %c0_i32_1 = arith.constant 0 : i32
    return %arg0, %c0_i32, %c0_i32_0 : i32, i32, i32
  }
}

</mosaic_0001>

<bundles_post_ra>
// kernel: deep_surv_forward.1
= control target key start
LH: loop header
LB: loop body
LE: loop exit
PB: predicated region body
PF: predicated region fallthrough
CT: control target
= control target key end

     0   :  { %s2469_s23 = smov 0   ;;  %s3149_s0 = inlined_call_operand.vmem [shape: bf16[2,196,75], index: 0, kind: input, shape index: {}]   ;;  %s3150_s1 = inlined_call_operand.vmem [shape: bf16[75,32], index: 1, kind: input, shape index: {}]   ;;  %s3151_s2 = inlined_call_operand.vmem [shape: bf16[9,36,196], index: 2, kind: input, shape index: {}]   ;;  %s3152_s3 = inlined_call_operand.vmem [shape: bf16[9,32,32], index: 3, kind: input, shape index: {}]   ;;  %s3153_s4 = inlined_call_operand.vmem [shape: f32[1,32], index: 4, kind: input, shape index: {}]   ;;  %s3154_s5 = inlined_call_operand.<no memory space> [shape: f32[1,1], index: 5, kind: input, shape index: {}]   ;;  %s3155_s6 = inlined_call_operand.vmem [shape: f32[2,1,1], index: 6, kind: output, shape index: {}]  }
   0x1   :  { %v11_v0 = vstv %s3154_s5 }
   0x2   :  { %12 = vst [vmem:[#allocation2] sm:$0x1] %v11_v0 }
   0x3 LB: > { %s1908_s24 = sadd.s32 4294967295, %s2428_s23   ;;  %p1912_p0 = scmp.ge.s32.totalorder %s2428_s23, 1  ;;  %s2428_s23 = sphi %s2469_s23, %s18_s23  }
   0x4   : > { %p214_p1 = scmp.lt.s32.totalorder %s2428_s23, 3 }
   0x6   : > { %p215_p2 = pnand %p1912_p0, %p214_p1 }
   0x7   : > { %p242_p3 = scmp.lt.s32.totalorder (!%p215_p2), %s1908_s24, 1 }
   0x8   : > { %218 = sbr.rel (%p215_p2) target bundleno = 1555 (0x613), region = 44 }
   0xd   : > { %v1980_v1 = vld [vmem:[%s3150_s1 + $0x20] sm:$0xf]  ;;  %v2355_v2 = vld [vmem:[%s3150_s1 + $0x20] sm:$0x30]  ;;  %vm418_vm0 = vcmask 1044480   ;;  %vm419_vm1 = vcmask 1045504  }
   0xe   : > { %v1981_v3 = vor.u32 %v2355_v2, %v1980_v1  ;;  %v2430_v4 = vmov 65535   ;;  %v2354_v8 = vld [vmem:[%s3150_s1 + $0x18] sm:$0xff]  ;;  %v2353_v9 = vld [vmem:[%s3150_s1 + $0x10] sm:$0xff]  ;;  %s3157_s24 = smov (!%p242_p3, %s1908_s24), 1  ;;  %v2352_v10 = vld [vmem:[%s3150_s1 + $0x8] sm:$0xff]  ;;  %vm378_vm2 = vcmask 613376  }
   0xf   : > { %v420_v5 = vsel %vm418_vm0, 4294967295, %v2430_v4  ;;  %s2412_s10 = smul.u32 100, %s3157_s24  ;;  %v2351_v11 = vld [vmem:[%s3150_s1] sm:$0xff]  ;;  %vm575_vm3 = vcmask 1041408   ;;  %vm565_vm4 = vcmask 556032   ;;  %vm737_vm5 = vcmask 261120   ;;  %s249_s11 = scalar_lea.vmem %s3155_s6, %s3157_s24 }
  0x10   : > { %v421_v6 = vsel %vm419_vm1, %v420_v5, 0  ;;  %vm1815_vm6 = vcmask 1046528   ;;  %vm1842_vm7 = vcmask 253952   ;;  %vm1859_vm8 = vcmask 0  }
  0x11   : > { %v423_v7 = vand.u32 %v1981_v3, %v421_v6  ;;  %s2502_s15 = scalar_lea.vmem %s3149_s0, %s2412_s10 }
  0x12   : > { %v2339_v12 = vld [vmem:[%s2502_s15] sm:$0xff]  ;;  %v2340_v13 = vld [vmem:[%s2502_s15 + $0x8] sm:$0xff]  ;;  %v2341_v14 = vld [vmem:[%s2502_s15 + $0x10] sm:$0xff] }
  0x13   : > { %428 = vmatpush.bf16.msra.mxu0 %v423_v7  ;;  %v2342_v15 = vld [vmem:[%s2502_s15 + $0x18] sm:$0xff]  ;;  %v2343_v16 = vld [vmem:[%s2502_s15 + $0x20] sm:$0xff]  ;;  %v2344_v17 = vld [vmem:[%s2502_s15 + $0x28] sm:$0xff] }
  0x14   : > { %v2345_v18 = vld [vmem:[%s2502_s15 + $0x30] sm:$0xff]  ;;  %v2346_v19 = vld [vmem:[%s2502_s15 + $0x38] sm:$0xff]  ;;  %v2347_v20 = vld [vmem:[%s2502_s15 + $0x40] sm:$0xff] }
  0x15   : > { %v2348_v26 = vld [vmem:[%s2502_s15 + $0x48] sm:$0xff]  ;;  %v2349_v29 = vld [vmem:[%s2502_s15 + $0x50] sm:$0xff]  ;;  %v2350_v32 = vld [vmem:[%s2502_s15 + $0x58] sm:$0xff] }
  0x16   : > { %v275_v35 = vld [vmem:[%s2502_s15 + $0x60] sm:$0x3] }
  0x17   : > { %429 = vmatpush.bf16.msra.mxu0 %v2354_v8  ;;  %v335_v36 = vunpack.c.l.b16 %v275_v35  ;;  %v2367_v8 = vld [vmem:[%s3152_s3 + $0x18] sm:$0xff] }
  0x18   : > { %v2359_v35 = vld [vmem:[%s3151_s2 + $0x14] sm:$0xf0] }
  0x19   : > { %v348_v37 = vpack.c.b16 %v335_v36, %v335_v36 }
  0x1b   : > { %430 = vmatpush.bf16.msra.mxu0 %v2353_v9  ;;  %v2586_v9 = vld [vmem:[%s3152_s3 + $0x58] sm:$0xff] }
  0x1f   : > { %431 = vmatpush.bf16.msra.mxu0 %v2352_v10  ;;  %v2366_v10 = vld [vmem:[%s3152_s3 + $0x10] sm:$0xff] }
  0x23   : > { %432 = vmatpush.bf16.msra.mxu0 %v2351_v11  ;;  %v2595_v11 = vld [vmem:[%s3152_s3 + $0x50] sm:$0xff] }
  0x26   : > { %1982 = vmatmul.msk.bf16.vlgmr.msra.gmra.mxu0 %vm378_vm2, %v2339_v12  ;;  %v1997_v12 = vld [vmem:[%s3151_s2] sm:$0xf] }
  0x36   : > { %1983 = vmatmul.msk.bf16.gmra.mxu0 %vm378_vm2, %v2340_v13  ;;  %v2357_v13 = vld [vmem:[%s3151_s2 + $0x4] sm:$0xf0] }
  0x46   : > { %1984 = vmatmul.msk.bf16.gmra.mxu0 %vm378_vm2, %v2341_v14  ;;  %v2188_v14 = vld [vmem:[%s3151_s2 + $0xc8] sm:$0xf] }
  0x56   : > { %1985 = vmatmul.msk.bf16.gmra.mxu0 %vm378_vm2, %v2342_v15  ;;  %v2387_v15 = vld [vmem:[%s3151_s2 + $0xcc] sm:$0xf0] }
  0x66   : > { %1986 = vmatmul.msk.bf16.gmra.mxu0 %vm378_vm2, %v2343_v16  ;;  %v1998_v16 = vor.u32 %v2357_v13, %v1997_v12 }
  0x76   : > { %1987 = vmatmul.msk.bf16.gmra.mxu0 %vm378_vm2, %v2344_v17  ;;  %v2189_v17 = vor.u32 %v2387_v15, %v2188_v14  ;;  %v2071_v15 = vld [vmem:[%s3151_s2 + $0x50] sm:$0xf] }
  0x86   : > { %1988 = vmatmul.msk.bf16.gmra.mxu0 %vm378_vm2, %v2345_v18 }
  0x96   : > { %1989 = vmatmul.msk.bf16.gmra.mxu0 %vm378_vm2, %v2346_v19 }
  0xa3   : > { %v434_v21 = vpop.f32.mrf.mxu0 }
  0xa4   : > { %v498_v23 = vmax.f32 %v434_v21, 0.0 }
  0xa6   : > { %1990 = vmatmul.msk.bf16.gmra.mxu0 %vm378_vm2, %v2347_v20 }
  0xab   : > { %v436_v22 = vpop.f32.mrf.mxu0 }
  0xac   : > { %v499_v24 = vmax.f32 %v436_v22, 0.0 }
  0xae   : > { %v2522_v25 = vpack.c.bf16 %v499_v24, %v498_v23 }
  0xb3   : > { %v2525_v27 = vpop.f32.mrf.mxu0 }
  0xb4   : > { %v500_v4 = vmax.f32 %v2525_v27, 0.0 }
  0xb6   : > { %1991 = vmatmul.msk.bf16.gmra.mxu0 %vm378_vm2, %v2348_v26 }
  0xbb   : > { %v2528_v28 = vpop.f32.mrf.mxu0 }
  0xbc   : > { %v501_v1 = vmax.f32 %v2528_v28, 0.0 }
  0xbe   : > { %v2572_v5 = vpack.c.bf16 %v501_v1, %v500_v4  ;;  %v2023_v1 = vld [vmem:[%s3151_s2 + $0x30] sm:$0xf0]  ;;  %v2018_v4 = vld [vmem:[%s3151_s2 + $0x48] sm:$0x33] }
  0xbf   : > { %v652_v13 = vunpack.c.h.b16 %v2018_v4 }
  0xc1   : > { %v658_v14 = vpack.c.b16 %v652_v13, %v652_v13  ;;  %v2381_v13 = vld [vmem:[%s3151_s2 + $0xa4] sm:$0xf0] }
  0xc3   : > { %v444_v30 = vpop.f32.mrf.mxu0 }
  0xc4   : > { %v502_v0 = vmax.f32 %v444_v30, 0.0 }
  0xc6   : > { %1992 = vmatmul.msk.bf16.gmra.mxu0 %vm378_vm2, %v2349_v29 }
  0xcb   : > { %v446_v31 = vpop.f32.mrf.mxu0 }
  0xcc   : > { %v503_v62 = vmax.f32 %v446_v31, 0.0 }
  0xce   : > { %v2566_v2 = vpack.c.bf16 %v503_v62, %v502_v0  ;;  %v2362_v0 = vld [vmem:[%s3151_s2 + $0x2c] sm:$0xf] }
  0xd3   : > { %v449_v33 = vpop.f32.mrf.mxu0 }
  0xd4   : > { %v504_v61 = vmax.f32 %v449_v33, 0.0 }
  0xd6   : > { %1993 = vmatmul.msk.bf16.gmra.mxu0 %vm378_vm2, %v2350_v32 }
  0xdb   : > { %v451_v34 = vpop.f32.mrf.mxu0 }
  0xdc   : > { %v505_v58 = vmax.f32 %v451_v34, 0.0  ;;  %v2005_v34 = vld [vmem:[%s3151_s2 + $0x10] sm:$0xf] }
  0xdd   : > { %v2006_v36 = vor.u32 %v2359_v35, %v2005_v34 }
  0xde   : > { %v2560_v63 = vpack.c.bf16 %v505_v58, %v504_v61  ;;  %v2365_v58 = vld [vmem:[%s3151_s2 + $0x3c] sm:$0xf0] }
  0xe3   : > { %v454_v38 = vpop.f32.mrf.mxu0 }
  0xe4   : > { %v506_v57 = vmax.f32 %v454_v38, 0.0 }
  0xe6   : > { %1994 = vmatmul.msk.bf16.gmra.mxu0 %vm378_vm2, %v348_v37 }
  0xeb   : > { %v456_v39 = vpop.f32.mrf.mxu0 }
  0xec   : > { %v507_v55 = vmax.f32 %v456_v39, 0.0 }
  0xee   : > { %v2553_v59 = vpack.c.bf16 %v507_v55, %v506_v57  ;;  %v2029_v57 = vld [vmem:[%s3151_s2 + $0x38] sm:$0xf] }
  0xf3   : > { %v459_v40 = vpop.f32.mrf.mxu0 }
  0xf4   : > { %v508_v54 = vmax.f32 %v459_v40, 0.0 }
  0xfb   : > { %v461_v41 = vpop.f32.mrf.mxu0 }
  0xfc   : > { %v509_v51 = vmax.f32 %v461_v41, 0.0  ;;  %v2356_v41 = vld [vmem:[%s3151_s2 + $0x4] sm:$0xf] }
  0xfe   : > { %v2548_v56 = vpack.c.bf16 %v509_v51, %v508_v54  ;;  %v2007_v54 = vld [vmem:[%s3151_s2 + $0x18] sm:$0xf0] }
 0x103   : > { %v464_v42 = vpop.f32.mrf.mxu0 }
 0x104   : > { %v510_v50 = vmax.f32 %v464_v42, 0.0  ;;  %v1999_v42 = vld [vmem:[%s3151_s2 + $0x8] sm:$0xf0] }
 0x10b   : > { %v466_v43 = vpop.f32.mrf.mxu0 }
 0x10c   : > { %v511_v48 = vmax.f32 %v466_v43, 0.0 }
 0x10e   : > { %v2541_v52 = vpack.c.bf16 %v511_v48, %v510_v50  ;;  %v2021_v48 = vld [vmem:[%s3151_s2 + $0x28] sm:$0xf]  ;;  %v2363_v50 = vld [vmem:[%s3151_s2 + $0x2c] sm:$0xf0] }
 0x10f   : > { %v2022_v51 = vor.u32 %v2363_v50, %v2021_v48  ;;  %v2118_v50 = vld [vmem:[%s3151_s2 + $0x88] sm:$0xf] }
 0x113   : > { %v469_v44 = vpop.f32.mrf.mxu0 }
 0x114   : > { %v512_v46 = vmax.f32 %v469_v44, 0.0  ;;  %v2002_v44 = vor.u32 %v2356_v41, %v1999_v42 }
 0x11b   : > { %v471_v45 = vpop.f32.mrf.mxu0 }
 0x11c   : > { %v513_v47 = vmax.f32 %v471_v45, 0.0  ;;  %v540_v45 = vld [vmem:[%s3151_s2 + $0x20] sm:$0x33] }
 0x11d   : > { %v555_v61 = vunpack.c.h.b16 %v540_v45 }
 0x11e   : > { %v2536_v49 = vpack.c.bf16 %v513_v47, %v512_v46  ;;  %v554_v46 = vunpack.c.l.b16 %v540_v45 }
 0x11f   : > { %v561_v62 = vpack.c.b16 %v555_v61, %v555_v61 }
 0x120   : > { %579 = vmatpush.bf16.msra.mxu1 %v2536_v49  ;;  %671 = vmatpush.bf16.msra.mxu3 %v2536_v49  ;;  %v560_v47 = vpack.c.b16 %v554_v46, %v554_v46 }
 0x121   : > { %1279 = vmatpush.bf16.msrb.mxu0 %v2536_v49 }
 0x123   : > { %v2543_v53 = vpop.f32.mrf.mxu0 }
 0x124   : > { %580 = vmatpush.bf16.msra.mxu1 %v2541_v52  ;;  %672 = vmatpush.bf16.msra.mxu3 %v2541_v52  ;;  %v514_v40 = vmax.f32 %v2543_v53, 0.0  ;;  %v2358_v53 = vld [vmem:[%s3151_s2 + $0x14] sm:$0xf] }
 0x125   : > { %1280 = vmatpush.bf16.msrb.mxu0 %v2541_v52  ;;  %v2010_v55 = vor.u32 %v2358_v53, %v2007_v54 }
 0x128   : > { %581 = vmatpush.bf16.msra.mxu1 %v2548_v56  ;;  %673 = vmatpush.bf16.msra.mxu3 %v2548_v56 }
 0x129   : > { %1281 = vmatpush.bf16.msrb.mxu0 %v2548_v56 }
 0x12b   : > { %v2555_v60 = vpop.f32.mrf.mxu0 }
 0x12c   : > { %582 = vmatpush.bf16.msra.mxu1 %v2553_v59  ;;  %674 = vmatpush.bf16.msra.mxu3 %v2553_v59  ;;  %v515_v38 = vmax.f32 %v2555_v60, 0.0  ;;  %v2030_v60 = vor.u32 %v2365_v58, %v2029_v57 }
 0x12d   : > { %1282 = vmatpush.bf16.msrb.mxu0 %v2553_v59 }
 0x12e   : > { %v2644_v43 = vpack.c.bf16 %v515_v38, %v514_v40 }
 0x130   : > { %583 = vmatpush.bf16.msra.mxu1 %v2560_v63  ;;  %675 = vmatpush.bf16.msra.mxu3 %v2560_v63 }
 0x131   : > { %1283 = vmatpush.bf16.msrb.mxu0 %v2560_v63 }
 0x133   : > { %v479_v3 = vpop.f32.mrf.mxu0 }
 0x134   : > { %584 = vmatpush.bf16.msra.mxu1 %v2566_v2  ;;  %676 = vmatpush.bf16.msra.mxu3 %v2566_v2  ;;  %v516_v37 = vmax.f32 %v479_v3, 0.0  ;;  %v2026_v3 = vor.u32 %v2362_v0, %v2023_v1 }
 0x135   : > { %1284 = vmatpush.bf16.msrb.mxu0 %v2566_v2 }
 0x138   : > { %585 = vmatpush.bf16.msra.mxu1 %v2572_v5  ;;  %677 = vmatpush.bf16.msra.mxu3 %v2572_v5 }
 0x139   : > { %1285 = vmatpush.bf16.msrb.mxu0 %v2572_v5 }
 0x13b   : > { %v481_v6 = vpop.f32.mrf.mxu0 }
 0x13c   : > { %586 = vmatpush.bf16.msra.mxu1 %v2522_v25  ;;  %678 = vmatpush.bf16.msra.mxu3 %v2522_v25  ;;  %v517_v32 = vmax.f32 %v481_v6, 0.0  ;;  %v651_v6 = vunpack.c.l.b16 %v2018_v4 }
 0x13d   : > { %1286 = vmatpush.bf16.msrb.mxu0 %v2522_v25 }
 0x13e   : > { %v2632_v39 = vpack.c.bf16 %v517_v32, %v516_v37  ;;  %v2375_v37 = vld [vmem:[%s3151_s2 + $0x7c] sm:$0xf0] }
 0x13f   : > { %587 = vmatmul.bf16.vlgmr.msra.gmra.mxu1 %v1998_v16  ;;  %679 = vmatmul.bf16.vlgmr.msra.gmra.mxu3 %v2022_v51  ;;  %v2369_v16 = vld [vmem:[%s3151_s2 + $0x54] sm:$0xf0]  ;;  %v2377_v51 = vld [vmem:[%s3151_s2 + $0x8c] sm:$0xf0] }
 0x140   : > { %753 = vmatpush.bf16.msrb.mxu1 %v2367_v8  ;;  %1287 = vmatmul.bf16.vlgmr.msrb.gmra.mxu0 %v2189_v17  ;;  %v2364_v8 = vld [vmem:[%s3151_s2 + $0x3c] sm:$0xf]  ;;  %v2072_v17 = vor.u32 %v2369_v16, %v2071_v15  ;;  %v2119_v57 = vor.u32 %v2377_v51, %v2118_v50  ;;  %v2386_v51 = vld [vmem:[%s3151_s2 + $0xcc] sm:$0xf] }
 0x141   : > { %1360 = vmatpush.bf16.msra.mxu0 %v2586_v9  ;;  %v2073_v50 = vld [vmem:[%s3151_s2 + $0x58] sm:$0xf0] }
 0x143   : > { %v484_v7 = vpop.f32.mrf.mxu0 }
 0x144   : > { %754 = vmatpush.bf16.msrb.mxu1 %v2366_v10  ;;  %v518_v31 = vmax.f32 %v484_v7, 0.0  ;;  %v657_v7 = vpack.c.b16 %v651_v6, %v651_v6  ;;  %v2031_v10 = vld [vmem:[%s3151_s2 + $0x40] sm:$0xf0] }
 0x145   : > { %1361 = vmatpush.bf16.msra.mxu0 %v2595_v11  ;;  %v2034_v12 = vor.u32 %v2364_v8, %v2031_v10 }
 0x14b   : > { %v486_v18 = vpop.f32.mrf.mxu0 }
 0x14c   : > { %v519_v28 = vmax.f32 %v486_v18, 0.0 }
 0x14e   : > { %v2620_v33 = vpack.c.bf16 %v519_v28, %v518_v31  ;;  %v2739_v28 = vld [vmem:[%s3151_s2 + $0x70] sm:$0x33] }
 0x14f   : > { %592 = vmatmul.bf16.gmra.mxu1 %v2006_v36  ;;  %684 = vmatmul.bf16.gmra.mxu3 %v2030_v60  ;;  %v2110_v36 = vld [vmem:[%s3151_s2 + $0x78] sm:$0xf] }
 0x150   : > { %v2111_v42 = vor.u32 %v2375_v37, %v2110_v36  ;;  %v2798_v36 = vld [vmem:[%s3151_s2 + $0xc0] sm:$0x33] }
 0x153   : > { %v489_v19 = vpop.f32.mrf.mxu0 }
 0x154   : > { %v520_v27 = vmax.f32 %v489_v19, 0.0  ;;  %v2361_v19 = vld [vmem:[%s3152_s3 + $0x8] sm:$0xff] }
 0x155   : > { %797 = vmatpush.bf16.msrb.mxu3 %v2361_v19 }
 0x15b   : > { %v491_v20 = vpop.f32.mrf.mxu0 }
 0x15c   : > { %v521_v24 = vmax.f32 %v491_v20, 0.0  ;;  %v2079_v20 = vld [vmem:[%s3151_s2 + $0x60] sm:$0xf] }
 0x15e   : > { %v2615_v29 = vpack.c.bf16 %v521_v24, %v520_v27  ;;  %v2360_v24 = vld [vmem:[%s3152_s3] sm:$0xff] }
 0x15f   : > { %597 = vmatmul.bf16.gmra.mxu1 %v560_v47  ;;  %689 = vmatmul.bf16.gmra.mxu3 %v657_v7 }
 0x160   : > { %798 = vmatpush.bf16.msrb.mxu3 %v2360_v24 }
 0x163   : > { %v494_v21 = vpop.f32.mrf.mxu0 }
 0x164   : > { %v522_v22 = vmax.f32 %v494_v21, 0.0  ;;  %v2371_v21 = vld [vmem:[%s3151_s2 + $0x64] sm:$0xf0] }
 0x166   : > { %v535_v23 = vpack.c.bf16 %v522_v22, %v522_v22 }
 0x168   : > { %v2610_v26 = vsel %vm575_vm3, %v535_v23, 0  ;;  %v2080_v23 = vor.u32 %v2371_v21, %v2079_v20  ;;  %v2157_v21 = vld [vmem:[%s3151_s2 + $0xb0] sm:$0xf] }
 0x169   : > { %605 = vmatpush.bf16.msra.mxu2 %v2610_v26  ;;  %879 = vmatpush.bf16.msra.mxu1 %v2610_v26 }
 0x16a   : > { %1447 = vmatpush.bf16.msrb.mxu0 %v2610_v26 }
 0x16b   : > { %v496_v30 = vpop.f32.mrf.mxu0 }
 0x16c   : > { %v833_v30 = vunpack.c.l.b16 %v2739_v28 }
 0x16d   : > { %606 = vmatpush.bf16.msra.mxu2 %v2615_v29  ;;  %880 = vmatpush.bf16.msra.mxu1 %v2615_v29 }
 0x16e   : > { %1448 = vmatpush.bf16.msrb.mxu0 %v2615_v29  ;;  %v839_v32 = vpack.c.b16 %v833_v30, %v833_v30 }
 0x171   : > { %607 = vmatpush.bf16.msra.mxu2 %v2620_v33  ;;  %881 = vmatpush.bf16.msra.mxu1 %v2620_v33 }
 0x172   : > { %1449 = vmatpush.bf16.msrb.mxu0 %v2620_v33 }
 0x175   : > { %608 = vmatpush.bf16.msra.mxu2 %v2632_v39  ;;  %882 = vmatpush.bf16.msra.mxu1 %v2632_v39 }
 0x176   : > { %1450 = vmatpush.bf16.msrb.mxu0 %v2632_v39 }
 0x179   : > { %609 = vmatpush.bf16.msra.mxu2 %v2644_v43  ;;  %883 = vmatpush.bf16.msra.mxu1 %v2644_v43 }
 0x17a   : > { %1451 = vmatpush.bf16.msrb.mxu0 %v2644_v43 }
 0x17c   : > { %2011 = vmatmul.msk.bf16.vlgmr.msra.gmra.mxu2 %vm565_vm4, %v2002_v44 }
 0x17d   : > { %697 = vmatpush.bf16.msrb.mxu2 %v2610_v26 }
 0x181   : > { %698 = vmatpush.bf16.msrb.mxu2 %v2615_v29 }
 0x185   : > { %699 = vmatpush.bf16.msrb.mxu2 %v2620_v33 }
 0x189   : > { %700 = vmatpush.bf16.msrb.mxu2 %v2632_v39 }
 0x18c   : > { %2012 = vmatmul.msk.bf16.gmra.mxu2 %vm565_vm4, %v2010_v55 }
 0x18d   : > { %701 = vmatpush.bf16.msrb.mxu2 %v2644_v43 }
 0x191   : > { %853 = vmatpush.bf16.msra.mxu2 %v2536_v49 }
 0x195   : > { %854 = vmatpush.bf16.msra.mxu2 %v2541_v52 }
 0x199   : > { %855 = vmatpush.bf16.msra.mxu2 %v2548_v56 }
 0x19c   : > { %2013 = vmatmul.msk.bf16.gmra.mxu2 %vm565_vm4, %v561_v62  ;;  %v2766_v62 = vld [vmem:[%s3151_s2 + $0x98] sm:$0x33] }
 0x19d   : > { %856 = vmatpush.bf16.msra.mxu2 %v2553_v59  ;;  %v975_v0 = vunpack.c.l.b16 %v2766_v62 }
 0x19f   : > { %v981_v4 = vpack.c.b16 %v975_v0, %v975_v0  ;;  %v2388_v0 = vld [vmem:[%s3151_s2 + $0xdc] sm:$0xf] }
 0x1a1   : > { %857 = vmatpush.bf16.msra.mxu2 %v2560_v63 }
 0x1a5   : > { %858 = vmatpush.bf16.msra.mxu2 %v2566_v2 }
 0x1a9   : > { %859 = vmatpush.bf16.msra.mxu2 %v2572_v5 }
 0x1ac   : > { %2035 = vmatmul.msk.bf16.vlgmr.msrb.gmra.mxu2 %vm565_vm4, %v2026_v3 }
 0x1ad   : > { %860 = vmatpush.bf16.msra.mxu2 %v2522_v25 }
 0x1b1   : > { %995 = vmatpush.bf16.msrb.mxu2 %v2536_v49 }
 0x1b5   : > { %996 = vmatpush.bf16.msrb.mxu2 %v2541_v52 }
 0x1b9   : > { %997 = vmatpush.bf16.msrb.mxu2 %v2548_v56 }
 0x1bc   : > { %2036 = vmatmul.msk.bf16.gmra.mxu2 %vm565_vm4, %v2034_v12  ;;  %v588_v18 = vpop.f32.mrf.mxu1  ;;  %v2149_v12 = vld [vmem:[%s3151_s2 + $0xa0] sm:$0xf] }
 0x1bd   : > { %998 = vmatpush.bf16.msrb.mxu2 %v2553_v59 }
 0x1c1   : > { %999 = vmatpush.bf16.msrb.mxu2 %v2560_v63 }
 0x1c2   : > { %v680_v46 = vpop.f32.mrf.mxu3 }
 0x1c4   : > { %v590_v22 = vpop.f32.mrf.mxu1 }
 0x1c5   : > { %1000 = vmatpush.bf16.msrb.mxu2 %v2566_v2 }
 0x1c9   : > { %1001 = vmatpush.bf16.msrb.mxu2 %v2572_v5 }
 0x1ca   : > { %v682_v48 = vpop.f32.mrf.mxu3 }
 0x1cc   : > { %2037 = vmatmul.msk.bf16.gmra.mxu2 %vm565_vm4, %v658_v14  ;;  %v593_v27 = vpop.f32.mrf.mxu1 }
 0x1cd   : > { %1002 = vmatpush.bf16.msrb.mxu2 %v2522_v25 }
 0x1d2   : > { %v685_v60 = vpop.f32.mrf.mxu3 }
 0x1d4   : > { %v595_v31 = vpop.f32.mrf.mxu1 }
 0x1da   : > { %v687_v6 = vpop.f32.mrf.mxu3 }
 0x1dc   : > { %861 = vmatmul.bf16.vlgmr.msra.gmra.mxu2 %v2072_v17  ;;  %v598_v35 = vpop.f32.mrf.mxu1  ;;  %v2150_v17 = vor.u32 %v2381_v13, %v2149_v12 }
 0x1dd   : > { %1137 = vmatpush.bf16.msra.mxu2 %v2536_v49 }
 0x1e1   : > { %1138 = vmatpush.bf16.msra.mxu2 %v2541_v52 }
 0x1e2   : > { %v690_v10 = vpop.f32.mrf.mxu3 }
 0x1e4   : > { %v600_v44 = vpop.f32.mrf.mxu1 }
 0x1e5   : > { %1139 = vmatpush.bf16.msra.mxu2 %v2548_v56 }
 0x1e9   : > { %1140 = vmatpush.bf16.msra.mxu2 %v2553_v59 }
 0x1ec   : > { %866 = vmatmul.bf16.gmra.mxu2 %v2080_v23  ;;  %v2397_v23 = vld [vmem:[%s3152_s3 + $0x68] sm:$0xff] }
 0x1ed   : > { %1141 = vmatpush.bf16.msra.mxu2 %v2560_v63 }
 0x1f1   : > { %1142 = vmatpush.bf16.msra.mxu2 %v2566_v2 }
 0x1f5   : > { %1143 = vmatpush.bf16.msra.mxu2 %v2572_v5 }
 0x1f9   : > { %1144 = vmatpush.bf16.msra.mxu2 %v2522_v25 }
 0x1fc   : > { %871 = vmatmul.bf16.gmra.mxu2 %v839_v32  ;;  %v2396_v32 = vld [vmem:[%s3152_s3 + $0x60] sm:$0xff] }
 0x1ff   : > { %v611_v34 = vpop.f32.mrf.mxu2 }
 0x200   : > { %v612_v40 = vadd.f32 %v611_v34, %v588_v18  ;;  %v692_v18 = vpop.f32.mrf.mxu3 }
 0x207   : > { %v613_v38 = vpop.f32.mrf.mxu2 }
 0x208   : > { %v614_v41 = vadd.f32 %v613_v38, %v590_v22  ;;  %v2383_v22 = vld [vmem:[%s3151_s2 + $0xb4] sm:$0xf0]  ;;  %v1117_v38 = vunpack.c.l.b16 %v2798_v36 }
 0x20a   : > { %v625_v45 = vpack.c.bf16 %v614_v41, %v612_v40 }
 0x20c   : > { %2061 = vmatmul.msk.bf16.vlgmr.msrb.gmra.mxu3 %vm737_vm5, %v625_v45  ;;  %1003 = vmatmul.bf16.vlgmr.msrb.gmra.mxu2 %v2111_v42  ;;  %v1123_v42 = vpack.c.b16 %v1117_v38, %v1117_v38  ;;  %v2196_v45 = vld [vmem:[%s3151_s2 + $0xd8] sm:$0xf] }
 0x20d   : > { %1305 = vmatpush.bf16.msrb.mxu2 %v2610_v26 }
 0x20f   : > { %v616_v47 = vpop.f32.mrf.mxu2 }
 0x210   : > { %v617_v54 = vadd.f32 %v616_v47, %v593_v27 }
 0x211   : > { %1306 = vmatpush.bf16.msrb.mxu2 %v2615_v29 }
 0x215   : > { %1307 = vmatpush.bf16.msrb.mxu2 %v2620_v33 }
 0x217   : > { %v618_v53 = vpop.f32.mrf.mxu2 }
 0x218   : > { %v619_v55 = vadd.f32 %v618_v53, %v595_v31  ;;  %v2158_v31 = vor.u32 %v2383_v22, %v2157_v21  ;;  %v2190_v53 = vld [vmem:[%s3151_s2 + $0xd0] sm:$0xf0]  ;;  %v2373_v21 = vld [vmem:[%s3152_s3 + $0x28] sm:$0xff] }
 0x219   : > { %1308 = vmatpush.bf16.msrb.mxu2 %v2632_v39  ;;  %934 = vmatpush.bf16.msra.mxu3 %v2373_v21  ;;  %v2376_v22 = vld [vmem:[%s3151_s2 + $0x8c] sm:$0xf]  ;;  %v1288_v21 = vpop.f32.mrf.mxu0 }
 0x21a   : > { %v626_v58 = vpack.c.bf16 %v619_v55, %v617_v54 }
 0x21c   : > { %2062 = vmatmul.msk.bf16.gmra.mxu3 %vm737_vm5, %v626_v58  ;;  %1008 = vmatmul.bf16.gmra.mxu2 %v2119_v57  ;;  %v2193_v57 = vor.u32 %v2386_v51, %v2190_v53 }
 0x21d   : > { %1309 = vmatpush.bf16.msrb.mxu2 %v2644_v43 }
 0x21f   : > { %v621_v61 = vpop.f32.mrf.mxu2 }
 0x220   : > { %v622_v1 = vadd.f32 %v621_v61, %v598_v35  ;;  %v2081_v61 = vld [vmem:[%s3151_s2 + $0x68] sm:$0xf0] }
 0x222   : > { %v627_v7 = vpack.c.bf16 %v622_v1, %v622_v1  ;;  %v2198_v1 = vld [vmem:[%s3151_s2 + $0xe0] sm:$0xf0] }
 0x227   : > { %v623_v3 = vpop.f32.mrf.mxu2 }
 0x22c   : > { %2063 = vmatmul.msk.bf16.gmra.mxu3 %vm737_vm5, %v627_v7  ;;  %1013 = vmatmul.bf16.gmra.mxu2 %v981_v4 }
 0x22f   : > { %v703_v8 = vpop.f32.mrf.mxu2 }
 0x230   : > { %v704_v15 = vadd.f32 %v703_v8, %v680_v46  ;;  %v2389_v46 = vld [vmem:[%s3151_s2 + $0xdc] sm:$0xf0]  ;;  %v834_v8 = vunpack.c.h.b16 %v2739_v28 }
 0x231   : > { %v2197_v47 = vor.u32 %v2389_v46, %v2196_v45  ;;  %v2151_v45 = vld [vmem:[%s3151_s2 + $0xa8] sm:$0xf0] }
 0x232   : > { %v840_v12 = vpack.c.b16 %v834_v8, %v834_v8 }
 0x233   : > { %1292 = vmatmul.bf16.gmra.mxu0 %v2197_v47 }
 0x237   : > { %v705_v14 = vpop.f32.mrf.mxu2 }
 0x238   : > { %v706_v16 = vadd.f32 %v705_v14, %v682_v48  ;;  %v2368_v48 = vld [vmem:[%s3151_s2 + $0x54] sm:$0xf] }
 0x239   : > { %v2076_v55 = vor.u32 %v2368_v48, %v2073_v50 }
 0x23a   : > { %v717_v19 = vpack.c.bf16 %v706_v16, %v704_v15  ;;  %v2374_v15 = vld [vmem:[%s3151_s2 + $0x7c] sm:$0xf]  ;;  %v2112_v16 = vld [vmem:[%s3151_s2 + $0x80] sm:$0xf0] }
 0x23b   : > { %v2115_v18 = vor.u32 %v2374_v15, %v2112_v16 }
 0x23c   : > { %2050 = vmatmul.msk.bf16.vlgmr.msrb.gmra.mxu1 %vm737_vm5, %v717_v19  ;;  %1145 = vmatmul.bf16.vlgmr.msra.gmra.mxu2 %v2150_v17 }
 0x23d   : > { %1021 = vmatpush.bf16.msrb.mxu1 %v2610_v26  ;;  %1502 = vmatpush.bf16.msra.mxu2 %v2397_v23  ;;  %v2120_v23 = vld [vmem:[%s3151_s2 + $0x90] sm:$0xf0] }
 0x23f   : > { %v708_v20 = vpop.f32.mrf.mxu2 }
 0x240   : > { %v709_v27 = vadd.f32 %v708_v20, %v685_v60  ;;  %v2370_v60 = vld [vmem:[%s3151_s2 + $0x64] sm:$0xf] }
 0x241   : > { %1022 = vmatpush.bf16.msrb.mxu1 %v2615_v29  ;;  %1503 = vmatpush.bf16.msra.mxu2 %v2396_v32  ;;  %v2084_v4 = vor.u32 %v2370_v60, %v2081_v61  ;;  %v2382_v60 = vld [vmem:[%s3151_s2 + $0xb4] sm:$0xf]  ;;  %v2159_v61 = vld [vmem:[%s3151_s2 + $0xb8] sm:$0xf0] }
 0x245   : > { %1023 = vmatpush.bf16.msrb.mxu1 %v2620_v33 }
 0x247   : > { %v710_v24 = vpop.f32.mrf.mxu2 }
 0x248   : > { %v711_v30 = vadd.f32 %v710_v24, %v687_v6  ;;  %v2201_v6 = vor.u32 %v2388_v0, %v2198_v1  ;;  %v2379_v1 = vld [vmem:[%s3152_s3 + $0x38] sm:$0xff] }
 0x249   : > { %1024 = vmatpush.bf16.msrb.mxu1 %v2632_v39 }
 0x24a   : > { %v718_v34 = vpack.c.bf16 %v711_v30, %v709_v27  ;;  %v2123_v27 = vor.u32 %v2376_v22, %v2120_v23 }
 0x24c   : > { %2051 = vmatmul.msk.bf16.gmra.mxu1 %vm737_vm5, %v718_v34  ;;  %1150 = vmatmul.bf16.gmra.mxu2 %v2158_v31  ;;  %v976_v31 = vunpack.c.h.b16 %v2766_v62  ;;  %v2380_v62 = vld [vmem:[%s3151_s2 + $0xa4] sm:$0xf] }
 0x24d   : > { %1025 = vmatpush.bf16.msrb.mxu1 %v2644_v43  ;;  %v2154_v47 = vor.u32 %v2380_v62, %v2151_v45 }
 0x24f   : > { %v713_v35 = vpop.f32.mrf.mxu2 }
 0x250   : > { %v714_v37 = vadd.f32 %v713_v35, %v690_v10  ;;  %v982_v35 = vpack.c.b16 %v976_v31, %v976_v31 }
 0x252   : > { %v719_v41 = vpack.c.bf16 %v714_v37, %v714_v37 }
 0x257   : > { %v715_v40 = vpop.f32.mrf.mxu2 }
 0x258   : > { %v2372_v40 = vld [vmem:[%s3152_s3 + $0x20] sm:$0xff] }
 0x259   : > { %935 = vmatpush.bf16.msra.mxu3 %v2372_v40 }
 0x25c   : > { %2052 = vmatmul.msk.bf16.gmra.mxu1 %vm737_vm5, %v719_v41  ;;  %1155 = vmatmul.bf16.gmra.mxu2 %v1123_v42 }
 0x25d   : > { %1076 = vmatpush.bf16.msrb.mxu3 %v2379_v1 }
 0x25f   : > { %v2802_v44 = vpop.f32.mrf.mxu2 }
 0x267   : > { %v2822_v54 = vpop.f32.mrf.mxu2 }
 0x26c   : > { %2085 = vmatmul.msk.bf16.vlgmr.msra.gmra.mxu1 %vm565_vm4, %v2076_v55  ;;  %2202 = vmatmul.msk.bf16.vlgmr.msrb.gmra.mxu2 %vm565_vm4, %v2193_v57  ;;  %v2185_v55 = vld [vmem:[%s3151_s2 + $0xe8] sm:$0x33] }
 0x26d   : > { %1163 = vmatpush.bf16.msra.mxu1 %v2610_v26  ;;  %1705 = vmatpush.bf16.msrb.mxu2 %v2536_v49  ;;  %v1260_v57 = vunpack.c.h.b16 %v2185_v55 }
 0x26f   : > { %v2828_v58 = vpop.f32.mrf.mxu2  ;;  %v1266_v0 = vpack.c.b16 %v1260_v57, %v1260_v57  ;;  %v2385_v57 = vld [vmem:[%s3152_s3 + $0x48] sm:$0xff] }
 0x271   : > { %1164 = vmatpush.bf16.msra.mxu1 %v2615_v29  ;;  %1706 = vmatpush.bf16.msrb.mxu2 %v2541_v52 }
 0x275   : > { %1165 = vmatpush.bf16.msra.mxu1 %v2620_v33  ;;  %1707 = vmatpush.bf16.msrb.mxu2 %v2548_v56 }
 0x277   : > { %v2846_v3 = vpop.f32.mrf.mxu2 }
 0x279   : > { %1166 = vmatpush.bf16.msra.mxu1 %v2632_v39  ;;  %1708 = vmatpush.bf16.msrb.mxu2 %v2553_v59 }
 0x27c   : > { %2086 = vmatmul.msk.bf16.gmra.mxu1 %vm565_vm4, %v2084_v4  ;;  %2203 = vmatmul.msk.bf16.gmra.mxu2 %vm565_vm4, %v2201_v6  ;;  %v2162_v6 = vor.u32 %v2382_v60, %v2159_v61 }
 0x27d   : > { %1167 = vmatpush.bf16.msra.mxu1 %v2644_v43  ;;  %1709 = vmatpush.bf16.msrb.mxu2 %v2560_v63 }
 0x27f   : > { %v2854_v7 = vpop.f32.mrf.mxu2 }
 0x281   : > { %1710 = vmatpush.bf16.msrb.mxu2 %v2566_v2 }
 0x285   : > { %1711 = vmatpush.bf16.msrb.mxu2 %v2572_v5 }
 0x287   : > { %v874_v10 = vpop.f32.mrf.mxu2 }
 0x288   : > { %v1259_v10 = vunpack.c.l.b16 %v2185_v55 }
 0x289   : > { %1712 = vmatpush.bf16.msrb.mxu2 %v2522_v25 }
 0x28c   : > { %2087 = vmatmul.msk.bf16.gmra.mxu1 %vm565_vm4, %v840_v12  ;;  %2204 = vmatmul.msk.bf16.gmra.mxu2 %vm565_vm4, %v1266_v0  ;;  %v2384_v0 = vld [vmem:[%s3152_s3 + $0x40] sm:$0xff] }
 0x28f   : > { %v800_v13 = vpop.f32.mrf.mxu3  ;;  %v2861_v14 = vpop.f32.mrf.mxu2 }
 0x297   : > { %v2869_v28 = vpop.f32.mrf.mxu3  ;;  %v2871_v17 = vpop.f32.mrf.mxu2 }
 0x29c   : > { %2124 = vmatmul.msk.bf16.vlgmr.msrb.gmra.mxu1 %vm565_vm4, %v2115_v18  ;;  %v1118_v18 = vunpack.c.h.b16 %v2798_v36 }
 0x29d   : > { %2410 = vmatpush.bf16.msrb.mxu1 %v2586_v9 }
 0x29e   : > { %v1124_v22 = vpack.c.b16 %v1118_v18, %v1118_v18 }
 0x29f   : > { %v805_v19 = vpop.f32.mrf.mxu3  ;;  %v2875_v20 = vpop.f32.mrf.mxu2 }
 0x2a1   : > { %2411 = vmatpush.bf16.msrb.mxu1 %v2595_v11 }
 0x2a7   : > { %v2887_v24 = vpop.f32.mrf.mxu3  ;;  %v2889_v9 = vpop.f32.mrf.mxu2 }
 0x2ac   : > { %2125 = vmatmul.msk.bf16.gmra.mxu1 %vm565_vm4, %v2123_v27  ;;  %v2378_v27 = vld [vmem:[%s3152_s3 + $0x30] sm:$0xff] }
 0x2ad   : > { %1077 = vmatpush.bf16.msrb.mxu3 %v2378_v27 }
 0x2af   : > { %v810_v11 = vpop.f32.mrf.mxu3  ;;  %v2892_v30 = vpop.f32.mrf.mxu2 }
 0x2b7   : > { %v812_v32 = vpop.f32.mrf.mxu3  ;;  %v1016_v34 = vpop.f32.mrf.mxu2 }
 0x2b8   : > { %v1290_v32 = vpop.f32.mrf.mxu0 }
 0x2b9   : > { %v756_v37 = vpop.f32.mrf.mxu1 }
 0x2ba   : > { %v2895_v38 = vadd.f32 %v800_v13, %v756_v37  ;;  %v1265_v13 = vpack.c.b16 %v1259_v10, %v1259_v10 }
 0x2bc   : > { %2126 = vmatmul.msk.bf16.gmra.mxu1 %vm565_vm4, %v982_v35  ;;  %1297 = vmatmul.bf16.gmra.mxu0 %v1265_v13 }
 0x2bf   : > { %v2901_v41 = vpop.f32.mrf.mxu2 }
 0x2c1   : > { %v2903_v42 = vpop.f32.mrf.mxu1 }
 0x2c7   : > { %v2911_v46 = vpop.f32.mrf.mxu2 }
 0x2c9   : > { %v761_v48 = vpop.f32.mrf.mxu1 }
 0x2ca   : > { %v2913_v50 = vadd.f32 %v805_v19, %v761_v48  ;;  %v1293_v48 = vpop.f32.mrf.mxu0 }
 0x2cc   : > { %2163 = vmatmul.msk.bf16.vlgmr.msra.gmra.mxu1 %vm565_vm4, %v2154_v47 }
 0x2cd   : > { %1563 = vmatpush.bf16.msra.mxu1 %v2536_v49 }
 0x2cf   : > { %v2917_v51 = vpop.f32.mrf.mxu2 }
 0x2d1   : > { %1564 = vmatpush.bf16.msra.mxu1 %v2541_v52  ;;  %v2920_v53 = vpop.f32.mrf.mxu1 }
 0x2d2   : > { %v1295_v1 = vpop.f32.mrf.mxu0 }
 0x2d5   : > { %1565 = vmatpush.bf16.msra.mxu1 %v2548_v56 }
 0x2d7   : > { %v2935_v4 = vpop.f32.mrf.mxu2 }
 0x2d9   : > { %1566 = vmatpush.bf16.msra.mxu1 %v2553_v59  ;;  %v766_v8 = vpop.f32.mrf.mxu1 }
 0x2da   : > { %v2939_v12 = vadd.f32 %v810_v11, %v766_v8 }
 0x2dc   : > { %2164 = vmatmul.msk.bf16.gmra.mxu1 %vm565_vm4, %v2162_v6 }
 0x2dd   : > { %1567 = vmatpush.bf16.msra.mxu1 %v2560_v63 }
 0x2df   : > { %v2943_v15 = vpop.f32.mrf.mxu2 }
 0x2e1   : > { %1568 = vmatpush.bf16.msra.mxu1 %v2566_v2  ;;  %v768_v16 = vpop.f32.mrf.mxu1 }
 0x2e5   : > { %1569 = vmatpush.bf16.msra.mxu1 %v2572_v5 }
 0x2e7   : > { %v1158_v19 = vpop.f32.mrf.mxu2 }
 0x2e9   : > { %1570 = vmatpush.bf16.msra.mxu1 %v2522_v25  ;;  %v885_v23 = vpop.f32.mrf.mxu1 }
 0x2ea   : > { %v886_v36 = vadd.f32 %v885_v23, %v2802_v44 }
 0x2ec   : > { %2165 = vmatmul.msk.bf16.gmra.mxu1 %vm565_vm4, %v1124_v22 }
 0x2ef   : > { %v1311_v11 = vpop.f32.mrf.mxu2 }
 0x2f0   : > { %v1312_v37 = vadd.f32 %v1311_v11, %v1288_v21 }
 0x2f1   : > { %v887_v31 = vpop.f32.mrf.mxu1 }
 0x2f2   : > { %v888_v34 = vadd.f32 %v887_v31, %v2822_v54 }
 0x2f4   : > { %v899_v35 = vpack.c.bf16 %v888_v34, %v886_v36 }
 0x2f6   : > { %2100 = vmatmul.msk.bf16.vlgmr.msra.gmra.mxu3 %vm737_vm5, %v899_v35 }
 0x2f7   : > { %v1313_v40 = vpop.f32.mrf.mxu2  ;;  %1218 = vmatpush.bf16.msra.mxu3 %v2385_v57 }
 0x2f8   : > { %v1314_v62 = vadd.f32 %v1313_v40, %v1290_v32 }
 0x2f9   : > { %v890_v45 = vpop.f32.mrf.mxu1 }
 0x2fa   : > { %v1325_v47 = vpack.c.bf16 %v1314_v62, %v1312_v37  ;;  %v891_v44 = vadd.f32 %v890_v45, %v2828_v58  ;;  %v2229_v37 = vld [vmem:[%s3151_s2 + $0xf8] sm:$0xf0] }
 0x2fb   : > { %1219 = vmatpush.bf16.msra.mxu3 %v2384_v0 }
 0x2fc   : > { %2217 = vmatmul.msk.bf16.vlgmr.msra.gmra.mxu0 %vm737_vm5, %v1325_v47  ;;  %v2394_v47 = vld [vmem:[%s3151_s2 + $0x104] sm:$0xf] }
 0x2ff   : > { %v1316_v55 = vpop.f32.mrf.mxu2 }
 0x300   : > { %v1317_v6 = vadd.f32 %v1316_v55, %v1293_v48 }
 0x301   : > { %v892_v60 = vpop.f32.mrf.mxu1 }
 0x302   : > { %v893_v54 = vadd.f32 %v892_v60, %v2846_v3  ;;  %v2393_v60 = vld [vmem:[%s3151_s2 + $0xf4] sm:$0xf0] }
 0x304   : > { %v900_v61 = vpack.c.bf16 %v893_v54, %v891_v44  ;;  %v2224_v54 = vld [vmem:[%s3151_s2 + $0x110] sm:$0x33] }
 0x305   : > { %v1402_v0 = vunpack.c.h.b16 %v2224_v54 }
 0x306   : > { %2101 = vmatmul.msk.bf16.gmra.mxu3 %vm737_vm5, %v900_v61 }
 0x307   : > { %v1318_v8 = vpop.f32.mrf.mxu2 }
 0x308   : > { %v1319_v10 = vadd.f32 %v1318_v8, %v1295_v1  ;;  %v1408_v1 = vpack.c.b16 %v1402_v0, %v1402_v0  ;;  %v2235_v8 = vld [vmem:[%s3151_s2 + $0x100] sm:$0xf] }
 0x309   : > { %v895_v13 = vpop.f32.mrf.mxu1 }
 0x30a   : > { %v1326_v16 = vpack.c.bf16 %v1319_v10, %v1317_v6  ;;  %v896_v58 = vadd.f32 %v895_v13, %v2854_v7  ;;  %v2395_v10 = vld [vmem:[%s3151_s2 + $0x104] sm:$0xf0] }
 0x30c   : > { %2218 = vmatmul.msk.bf16.vlgmr.msrb.gmra.mxu1 %vm737_vm5, %v1326_v16  ;;  %v901_v18 = vpack.c.bf16 %v896_v58, %v896_v58  ;;  %v2236_v16 = vor.u32 %v2395_v10, %v2235_v8 }
 0x30d   : > { %1731 = vmatpush.bf16.msrb.mxu1 %v2610_v26 }
 0x311   : > { %1732 = vmatpush.bf16.msrb.mxu1 %v2615_v29  ;;  %v897_v3 = vpop.f32.mrf.mxu1 }
 0x315   : > { %1733 = vmatpush.bf16.msrb.mxu1 %v2620_v33 }
 0x316   : > { %2102 = vmatmul.msk.bf16.gmra.mxu3 %vm737_vm5, %v901_v18  ;;  %v2266_v18 = vld [vmem:[%s3151_s2 + $0x118] sm:$0xf] }
 0x319   : > { %1734 = vmatpush.bf16.msrb.mxu1 %v2632_v39  ;;  %v1027_v19 = vpop.f32.mrf.mxu1 }
 0x31a   : > { %v1028_v22 = vadd.f32 %v1027_v19, %v2861_v14 }
 0x31d   : > { %1735 = vmatpush.bf16.msrb.mxu1 %v2644_v43 }
 0x321   : > { %v1029_v21 = vpop.f32.mrf.mxu1 }
 0x322   : > { %v1030_v23 = vadd.f32 %v1029_v21, %v2871_v17  ;;  %v1401_v21 = vunpack.c.l.b16 %v2224_v54  ;;  %v808_v54 = vadd.f32 %v2887_v24, %v2920_v53 }
 0x324   : > { %v1041_v27 = vpack.c.bf16 %v1030_v23, %v1028_v22  ;;  %v1407_v23 = vpack.c.b16 %v1401_v21, %v1401_v21 }
 0x326   : > { %2139 = vmatmul.msk.bf16.vlgmr.msrb.gmra.mxu3 %vm737_vm5, %v1041_v27 }
 0x327   : > { %1421 = vmatpush.bf16.msrb.mxu3 %v2536_v49 }
 0x329   : > { %v1032_v7 = vpop.f32.mrf.mxu1 }
 0x32a   : > { %v1033_v31 = vadd.f32 %v1032_v7, %v2875_v20 }
 0x32b   : > { %1422 = vmatpush.bf16.msrb.mxu3 %v2541_v52 }
 0x32f   : > { %1423 = vmatpush.bf16.msrb.mxu3 %v2548_v56 }
 0x331   : > { %v1034_v11 = vpop.f32.mrf.mxu1 }
 0x332   : > { %v1035_v32 = vadd.f32 %v1034_v11, %v2889_v9  ;;  %v2401_v11 = vld [vmem:[%s3151_s2 + $0x12c] sm:$0xf0] }
 0x333   : > { %1424 = vmatpush.bf16.msrb.mxu3 %v2553_v59 }
 0x334   : > { %v1042_v14 = vpack.c.bf16 %v1035_v32, %v1033_v31  ;;  %v2398_v32 = vld [vmem:[%s3151_s2 + $0x11c] sm:$0xf] }
 0x336   : > { %2140 = vmatmul.msk.bf16.gmra.mxu3 %vm737_vm5, %v1042_v14  ;;  %v2268_v14 = vld [vmem:[%s3151_s2 + $0x120] sm:$0xf0] }
 0x337   : > { %1425 = vmatpush.bf16.msrb.mxu3 %v2560_v63 }
 0x339   : > { %v1037_v17 = vpop.f32.mrf.mxu1 }
 0x33a   : > { %v1038_v49 = vadd.f32 %v1037_v17, %v2892_v30  ;;  %v1321_v30 = vpop.f32.mrf.mxu2 }
 0x33b   : > { %1426 = vmatpush.bf16.msrb.mxu3 %v2566_v2 }
 0x33c   : > { %v1043_v56 = vpack.c.bf16 %v1038_v49, %v1038_v49  ;;  %v2271_v49 = vor.u32 %v2398_v32, %v2268_v14  ;;  %v2404_v32 = vld [vmem:[%s3151_s2 + $0x144] sm:$0xf]  ;;  %v2307_v14 = vld [vmem:[%s3151_s2 + $0x148] sm:$0xf0] }
 0x33f   : > { %1427 = vmatpush.bf16.msrb.mxu3 %v2572_v5  ;;  %v1298_v5 = vpop.f32.mrf.mxu0 }
 0x341   : > { %v1039_v52 = vpop.f32.mrf.mxu1 }
 0x342   : > { %v1323_v40 = vpop.f32.mrf.mxu2 }
 0x343   : > { %1428 = vmatpush.bf16.msrb.mxu3 %v2522_v25  ;;  %v1322_v25 = vadd.f32 %v1321_v30, %v1298_v5 }
 0x345   : > { %v1327_v34 = vpack.c.bf16 %v1322_v25, %v1322_v25 }
 0x346   : > { %2141 = vmatmul.msk.bf16.gmra.mxu3 %vm737_vm5, %v1043_v56 }
 0x347   : > { %2219 = vmatmul.msk.bf16.gmra.mxu1 %vm737_vm5, %v1327_v34 }
 0x349   : > { %v1169_v20 = vpop.f32.mrf.mxu1 }
 0x34a   : > { %v1170_v9 = vadd.f32 %v1169_v20, %v2901_v41  ;;  %v2400_v20 = vld [vmem:[%s3151_s2 + $0x12c] sm:$0xf] }
 0x351   : > { %v1171_v59 = vpop.f32.mrf.mxu1 }
 0x352   : > { %v1172_v36 = vadd.f32 %v1171_v59, %v2911_v46  ;;  %v2276_v59 = vld [vmem:[%s3151_s2 + $0x130] sm:$0xf0] }
 0x354   : > { %v1183_v63 = vpack.c.bf16 %v1172_v36, %v1170_v9  ;;  %v2263_v9 = vld [vmem:[%s3151_s2 + $0x138] sm:$0x33] }
 0x356   : > { %2178 = vmatmul.msk.bf16.vlgmr.msra.gmra.mxu3 %vm737_vm5, %v1183_v63  ;;  %v1543_v63 = vunpack.c.l.b16 %v2263_v9 }
 0x357   : > { %1589 = vmatpush.bf16.msra.mxu3 %v2610_v26  ;;  %v2392_v26 = vld [vmem:[%s3151_s2 + $0xf4] sm:$0xf] }
 0x358   : > { %v1549_v5 = vpack.c.b16 %v1543_v63, %v1543_v63  ;;  %v2406_v63 = vld [vmem:[%s3151_s2 + $0x154] sm:$0xf] }
 0x359   : > { %v1174_v2 = vpop.f32.mrf.mxu1 }
 0x35a   : > { %v1175_v41 = vadd.f32 %v1174_v2, %v2917_v51  ;;  %v2279_v2 = vor.u32 %v2400_v20, %v2276_v59 }
 0x35b   : > { %1590 = vmatpush.bf16.msra.mxu3 %v2615_v29  ;;  %v1300_v29 = vpop.f32.mrf.mxu0 }
 0x35f   : > { %1591 = vmatpush.bf16.msra.mxu3 %v2620_v33  ;;  %v2232_v33 = vor.u32 %v2392_v26, %v2229_v37 }
 0x361   : > { %v1176_v35 = vpop.f32.mrf.mxu1  ;;  %2241 = vmatmul.msk.bf16.vlgmr.msrb.gmra.mxu0 %vm565_vm4, %v2232_v33 }
 0x362   : > { %v1177_v46 = vadd.f32 %v1176_v35, %v2935_v4  ;;  %v1544_v35 = vunpack.c.h.b16 %v2263_v9 }
 0x363   : > { %1592 = vmatpush.bf16.msra.mxu3 %v2632_v39  ;;  %v2237_v39 = vld [vmem:[%s3151_s2 + $0x108] sm:$0xf0] }
 0x364   : > { %v1184_v62 = vpack.c.bf16 %v1177_v46, %v1175_v41  ;;  %v2240_v48 = vor.u32 %v2394_v47, %v2237_v39  ;;  %v1550_v26 = vpack.c.b16 %v1544_v35, %v1544_v35  ;;  %v2405_v35 = vld [vmem:[%s3151_s2 + $0x144] sm:$0xf0] }
 0x366   : > { %2179 = vmatmul.msk.bf16.gmra.mxu3 %vm737_vm5, %v1184_v62  ;;  %v803_v62 = vadd.f32 %v2869_v28, %v2903_v42 }
 0x367   : > { %1593 = vmatpush.bf16.msra.mxu3 %v2644_v43 }
 0x369   : > { %v1179_v51 = vpop.f32.mrf.mxu1 }
 0x36a   : > { %v1180_v4 = vadd.f32 %v1179_v51, %v2943_v15  ;;  %v2227_v15 = vld [vmem:[%s3151_s2 + $0xf0] sm:$0xf] }
 0x36b   : > { %v2228_v61 = vor.u32 %v2393_v60, %v2227_v15 }
 0x36c   : > { %v1185_v55 = vpack.c.bf16 %v1180_v4, %v1180_v4 }
 0x371   : > { %v1181_v45 = vpop.f32.mrf.mxu1  ;;  %2242 = vmatmul.msk.bf16.gmra.mxu0 %vm565_vm4, %v2240_v48 }
 0x376   : > { %2180 = vmatmul.msk.bf16.gmra.mxu3 %vm737_vm5, %v1185_v55 }
 0x379   : > { %v937_v57 = vpop.f32.mrf.mxu3  ;;  %v1363_v46 = vpop.f32.mrf.mxu0 }
 0x37a   : > { %v951_v43 = vadd.f32 %v937_v57, %v2895_v38 }
 0x381   : > { %v939_v44 = vpop.f32.mrf.mxu3  ;;  %2243 = vmatmul.msk.bf16.gmra.mxu0 %vm565_vm4, %v1408_v1  ;;  %v1365_v33 = vpop.f32.mrf.mxu0 }
 0x382   : > { %v952_v45 = vadd.f32 %v939_v44, %v803_v62 }
 0x386   : > { %1429 = vmatmul.bf16.vlgmr.msrb.gmra.mxu3 %v2228_v61 }
 0x389   : > { %v942_v38 = vpop.f32.mrf.mxu3  ;;  %v1368_v34 = vpop.f32.mrf.mxu1 }
 0x38a   : > { %v953_v6 = vadd.f32 %v942_v38, %v2913_v50  ;;  %v2399_v50 = vld [vmem:[%s3151_s2 + $0x11c] sm:$0xf0] }
 0x38b   : > { %v2267_v19 = vor.u32 %v2399_v50, %v2266_v18 }
 0x38d   : > { %1571 = vmatmul.bf16.vlgmr.msra.gmra.mxu1 %v2267_v19 }
 0x391   : > { %v944_v13 = vpop.f32.mrf.mxu3  ;;  %v1370_v37 = vpop.f32.mrf.mxu1 }
 0x392   : > { %v954_v28 = vadd.f32 %v944_v13, %v808_v54 }
 0x396   : > { %1434 = vmatmul.bf16.gmra.mxu3 %v2236_v16 }
 0x399   : > { %v947_v58 = vpop.f32.mrf.mxu3 }
 0x39a   : > { %v955_v3 = vadd.f32 %v947_v58, %v2939_v12  ;;  %v2274_v12 = vld [vmem:[%s3151_s2 + $0x128] sm:$0xf] }
 0x39b   : > { %v2275_v31 = vor.u32 %v2401_v11, %v2274_v12 }
 0x39d   : > { %1576 = vmatmul.bf16.gmra.mxu1 %v2275_v31  ;;  %v2402_v31 = vld [vmem:[%s3152_s3 + $0x70] sm:$0xff] }
 0x3a1   : > { %v949_v22 = vpop.f32.mrf.mxu3 }
 0x3a6   : > { %1439 = vmatmul.bf16.gmra.mxu3 %v1407_v23  ;;  %v2403_v23 = vld [vmem:[%s3152_s3 + $0x78] sm:$0xff] }
 0x3a7   : > { %1644 = vmatpush.bf16.msra.mxu0 %v2403_v23 }
 0x3a9   : > { %v1079_v27 = vpop.f32.mrf.mxu3 }
 0x3aa   : > { %v1093_v7 = vadd.f32 %v1079_v27, %v951_v43 }
 0x3ab   : > { %1645 = vmatpush.bf16.msra.mxu0 %v2402_v31 }
 0x3ad   : > { %1581 = vmatmul.bf16.gmra.mxu1 %v1549_v5 }
 0x3b1   : > { %v1081_v17 = vpop.f32.mrf.mxu3 }
 0x3b2   : > { %v1094_v47 = vadd.f32 %v1081_v17, %v952_v45  ;;  %v2310_v17 = vor.u32 %v2404_v32, %v2307_v14 }
 0x3b6   : > { %2280 = vmatmul.msk.bf16.vlgmr.msra.gmra.mxu3 %vm565_vm4, %v2271_v49 }
 0x3b9   : > { %v1084_v52 = vpop.f32.mrf.mxu3 }
 0x3ba   : > { %v1095_v56 = vadd.f32 %v1084_v52, %v953_v6 }
 0x3bd   : > { %2319 = vmatmul.msk.bf16.vlgmr.msrb.gmra.mxu1 %vm565_vm4, %v2310_v17 }
 0x3c1   : > { %v1086_v36 = vpop.f32.mrf.mxu3 }
 0x3c2   : > { %v1096_v42 = vadd.f32 %v1086_v36, %v954_v28 }
 0x3c4   : > { %v1373_v4 = vpop.f32.mrf.mxu1 }
 0x3c6   : > { %2281 = vmatmul.msk.bf16.gmra.mxu3 %vm565_vm4, %v2279_v2  ;;  %v2315_v2 = vld [vmem:[%s3151_s2 + $0x158] sm:$0xf0] }
 0x3c7   : > { %v2318_v5 = vor.u32 %v2406_v63, %v2315_v2 }
 0x3c9   : > { %v1089_v30 = vpop.f32.mrf.mxu3 }
 0x3ca   : > { %v1097_v25 = vadd.f32 %v1089_v30, %v955_v3 }
 0x3cc   : > { %v1375_v43 = vpop.f32.mrf.mxu1 }
 0x3cd   : > { %2320 = vmatmul.msk.bf16.gmra.mxu1 %vm565_vm4, %v2318_v5 }
 0x3d1   : > { %v1091_v41 = vpop.f32.mrf.mxu3 }
 0x3d6   : > { %2282 = vmatmul.msk.bf16.gmra.mxu3 %vm565_vm4, %v1550_v26 }
 0x3d9   : > { %v1221_v29 = vpop.f32.mrf.mxu3 }
 0x3da   : > { %v1235_v40 = vadd.f32 %v1221_v29, %v1093_v7 }
 0x3dc   : > { %v3069_v51 = vadd.f32 %v1363_v46, %v1235_v40 }
 0x3de   : > { %v1453_v55 = vpop.f32.mrf.mxu0 }
 0x3e1   : > { %v1223_v39 = vpop.f32.mrf.mxu3 }
 0x3e2   : > { %v1236_v48 = vadd.f32 %v1223_v39, %v1094_v47  ;;  %v2313_v39 = vld [vmem:[%s3151_s2 + $0x150] sm:$0xf] }
 0x3e4   : > { %v3071_v57 = vadd.f32 %v1365_v33, %v1236_v48  ;;  %v2302_v33 = vld [vmem:[%s3151_s2 + $0x160] sm:$0x33]  ;;  %v2407_v48 = vld [vmem:[%s3151_s2 + $0x154] sm:$0xf0] }
 0x3e5   : > { %v1686_v62 = vunpack.c.h.b16 %v2302_v33 }
 0x3e6   : > { %v1455_v0 = vpop.f32.mrf.mxu0 }
 0x3e9   : > { %v1226_v15 = vpop.f32.mrf.mxu3 }
 0x3ea   : > { %v1237_v60 = vadd.f32 %v1226_v15, %v1095_v56 }
 0x3ec   : > { %v3075_v61 = vadd.f32 %v1368_v34, %v1237_v60  ;;  %v2305_v34 = vld [vmem:[%s3151_s2 + $0x140] sm:$0xf]  ;;  %v2314_v60 = vor.u32 %v2407_v48, %v2313_v39 }
 0x3ee   : > { %v1458_v6 = vpop.f32.mrf.mxu0 }
 0x3f1   : > { %v1228_v1 = vpop.f32.mrf.mxu3 }
 0x3f2   : > { %v1238_v38 = vadd.f32 %v1228_v1, %v1096_v42  ;;  %v1685_v42 = vunpack.c.l.b16 %v2302_v33 }
 0x3f4   : > { %v3077_v44 = vadd.f32 %v1370_v37, %v1238_v38  ;;  %v2306_v37 = vor.u32 %v2405_v35, %v2305_v34 }
 0x3f6   : > { %v1460_v3 = vpop.f32.mrf.mxu0 }
 0x3f9   : > { %v1231_v8 = vpop.f32.mrf.mxu3 }
 0x3fa   : > { %v1239_v10 = vadd.f32 %v1231_v8, %v1097_v25  ;;  %v2409_v8 = vld [vmem:[%s3152_s3 + $0x88] sm:$0xff] }
 0x3fb   : > { %1786 = vmatpush.bf16.msrb.mxu3 %v2409_v8 }
 0x3fc   : > { %v3079_v16 = vadd.f32 %v1373_v4, %v1239_v10  ;;  %v1692_v4 = vpack.c.b16 %v1686_v62, %v1686_v62 }
 0x3fe   : > { %v1463_v50 = vpop.f32.mrf.mxu0  ;;  %2321 = vmatmul.msk.bf16.gmra.mxu1 %vm565_vm4, %v1692_v4 }
 0x401   : > { %v1233_v58 = vpop.f32.mrf.mxu3 }
 0x406   : > { %v1465_v24 = vpop.f32.mrf.mxu0 }
 0x409   : > { %v1430_v18 = vpop.f32.mrf.mxu3 }
 0x40a   : > { %v1454_v53 = vadd.f32 %v1453_v55, %v1430_v18  ;;  %v1572_v27 = vpop.f32.mrf.mxu1 }
 0x411   : > { %v1432_v19 = vpop.f32.mrf.mxu3 }
 0x412   : > { %v1456_v21 = vadd.f32 %v1455_v0, %v1432_v19  ;;  %v1574_v52 = vpop.f32.mrf.mxu1 }
 0x414   : > { %v1467_v22 = vpack.c.bf16 %v1456_v21, %v1454_v53 }
 0x416   : > { %2256 = vmatmul.msk.bf16.vlgmr.msra.gmra.mxu2 %vm737_vm5, %v1467_v22 }
 0x419   : > { %v1435_v13 = vpop.f32.mrf.mxu3 }
 0x41a   : > { %v1459_v12 = vadd.f32 %v1458_v6, %v1435_v13  ;;  %v1577_v59 = vpop.f32.mrf.mxu1  ;;  %v1691_v6 = vpack.c.b16 %v1685_v42, %v1685_v42 }
 0x421   : > { %v1437_v7 = vpop.f32.mrf.mxu3 }
 0x422   : > { %v1461_v11 = vadd.f32 %v1460_v3, %v1437_v7  ;;  %v1579_v25 = vpop.f32.mrf.mxu1  ;;  %v2408_v3 = vld [vmem:[%s3152_s3 + $0x80] sm:$0xff] }
 0x423   : > { %1787 = vmatpush.bf16.msrb.mxu3 %v2408_v3 }
 0x424   : > { %v1468_v49 = vpack.c.bf16 %v1461_v11, %v1459_v12 }
 0x426   : > { %2257 = vmatmul.msk.bf16.gmra.mxu2 %vm737_vm5, %v1468_v49 }
 0x429   : > { %v1440_v56 = vpop.f32.mrf.mxu3 }
 0x42a   : > { %v1464_v20 = vadd.f32 %v1463_v50, %v1440_v56  ;;  %v1582_v29 = vpop.f32.mrf.mxu1 }
 0x42c   : > { %v1469_v36 = vpack.c.bf16 %v1464_v20, %v1464_v20 }
 0x431   : > { %v1442_v9 = vpop.f32.mrf.mxu3 }
 0x432   : > { %v1584_v47 = vpop.f32.mrf.mxu1 }
 0x436   : > { %2258 = vmatmul.msk.bf16.gmra.mxu2 %vm737_vm5, %v1469_v36 }
 0x439   : > { %v1595_v30 = vpop.f32.mrf.mxu3 }
 0x43a   : > { %v1596_v41 = vadd.f32 %v1595_v30, %v1572_v27  ;;  %v1737_v19 = vpop.f32.mrf.mxu1 }
 0x441   : > { %v1597_v46 = vpop.f32.mrf.mxu3 }
 0x442   : > { %v1598_v26 = vadd.f32 %v1597_v46, %v1574_v52  ;;  %v1739_v21 = vpop.f32.mrf.mxu1 }
 0x444   : > { %v1609_v40 = vpack.c.bf16 %v1598_v26, %v1596_v41 }
 0x446   : > { %2295 = vmatmul.msk.bf16.vlgmr.msra.gmra.mxu0 %vm737_vm5, %v1609_v40  ;;  %1713 = vmatmul.bf16.vlgmr.msrb.gmra.mxu2 %v2306_v37 }
 0x449   : > { %v1600_v45 = vpop.f32.mrf.mxu3 }
 0x44a   : > { %v1601_v55 = vadd.f32 %v1600_v45, %v1577_v59  ;;  %v1742_v23 = vpop.f32.mrf.mxu1 }
 0x451   : > { %v1602_v43 = vpop.f32.mrf.mxu3 }
 0x452   : > { %v1603_v15 = vadd.f32 %v1602_v43, %v1579_v25  ;;  %v1744_v12 = vpop.f32.mrf.mxu1 }
 0x454   : > { %v1610_v54 = vpack.c.bf16 %v1603_v15, %v1601_v55 }
 0x456   : > { %2296 = vmatmul.msk.bf16.gmra.mxu0 %vm737_vm5, %v1610_v54  ;;  %1718 = vmatmul.bf16.gmra.mxu2 %v2314_v60 }
 0x459   : > { %v1605_v0 = vpop.f32.mrf.mxu3 }
 0x45a   : > { %v1606_v28 = vadd.f32 %v1605_v0, %v1582_v29 }
 0x45c   : > { %v1611_v38 = vpack.c.bf16 %v1606_v28, %v1606_v28 }
 0x461   : > { %v1607_v1 = vpop.f32.mrf.mxu3 }
 0x466   : > { %2297 = vmatmul.msk.bf16.gmra.mxu0 %vm737_vm5, %v1611_v38  ;;  %1723 = vmatmul.bf16.gmra.mxu2 %v1691_v6 }
 0x47b   : > { %v1747_v14 = vpop.f32.mrf.mxu1 }
 0x483   : > { %v1749_v52 = vpop.f32.mrf.mxu1 }
 0x484   : > { %v1857_v52 = vld [vmem:[#allocation2] sm:$0x1] }
 0x499   : > { %v1505_v10 = vpop.f32.mrf.mxu2 }
 0x49a   : > { %v1519_v58 = vadd.f32 %v1505_v10, %v3069_v51 }
 0x4a1   : > { %v1507_v18 = vpop.f32.mrf.mxu2 }
 0x4a2   : > { %v1520_v50 = vadd.f32 %v1507_v18, %v3071_v57 }
 0x4a9   : > { %v1510_v24 = vpop.f32.mrf.mxu2 }
 0x4aa   : > { %v1521_v53 = vadd.f32 %v1510_v24, %v3075_v61 }
 0x4b1   : > { %v1512_v22 = vpop.f32.mrf.mxu2 }
 0x4b2   : > { %v1522_v13 = vadd.f32 %v1512_v22, %v3077_v44 }
 0x4b9   : > { %v1515_v27 = vpop.f32.mrf.mxu2 }
 0x4ba   : > { %v1523_v51 = vadd.f32 %v1515_v27, %v3079_v16 }
 0x4c1   : > { %v1517_v7 = vpop.f32.mrf.mxu2 }
 0x4c3   : > { %v1647_v11 = vpop.f32.mrf.mxu0 }
 0x4c4   : > { %v1661_v31 = vadd.f32 %v1647_v11, %v1519_v58 }
 0x4c9   : > { %v1714_v32 = vpop.f32.mrf.mxu2 }
 0x4ca   : > { %v1738_v56 = vadd.f32 %v1737_v19, %v1714_v32 }
 0x4cb   : > { %v1649_v17 = vpop.f32.mrf.mxu0 }
 0x4cc   : > { %v1662_v57 = vadd.f32 %v1649_v17, %v1520_v50 }
 0x4d1   : > { %v1716_v49 = vpop.f32.mrf.mxu2 }
 0x4d2   : > { %v1740_v61 = vadd.f32 %v1739_v21, %v1716_v49 }
 0x4d3   : > { %v1652_v20 = vpop.f32.mrf.mxu0 }
 0x4d4   : > { %v1751_v59 = vpack.c.bf16 %v1740_v61, %v1738_v56  ;;  %v1663_v9 = vadd.f32 %v1652_v20, %v1521_v53 }
 0x4d6   : > { %2334 = vmatmul.msk.bf16.vlgmr.msrb.gmra.mxu3 %vm737_vm5, %v1751_v59 }
 0x4d9   : > { %v1719_v44 = vpop.f32.mrf.mxu2 }
 0x4da   : > { %v1743_v2 = vadd.f32 %v1742_v23, %v1719_v44 }
 0x4db   : > { %v1654_v36 = vpop.f32.mrf.mxu0 }
 0x4dc   : > { %v1664_v16 = vadd.f32 %v1654_v36, %v1522_v13 }
 0x4e1   : > { %v1721_v63 = vpop.f32.mrf.mxu2 }
 0x4e2   : > { %v1745_v5 = vadd.f32 %v1744_v12, %v1721_v63 }
 0x4e3   : > { %v1657_v30 = vpop.f32.mrf.mxu0 }
 0x4e4   : > { %v1752_v25 = vpack.c.bf16 %v1745_v5, %v1743_v2  ;;  %v1665_v34 = vadd.f32 %v1657_v30, %v1523_v51 }
 0x4e6   : > { %2335 = vmatmul.msk.bf16.gmra.mxu3 %vm737_vm5, %v1752_v25 }
 0x4e9   : > { %v1724_v35 = vpop.f32.mrf.mxu2 }
 0x4ea   : > { %v1748_v46 = vadd.f32 %v1747_v14, %v1724_v35  ;;  %v1852_v14 = vld [vmem:[%s3153_s4] sm:$0x1] }
 0x4eb   : > { %v1659_v41 = vpop.f32.mrf.mxu0 }
 0x4ec   : > { %v1753_v37 = vpack.c.bf16 %v1748_v46, %v1748_v46 }
 0x4f1   : > { %v1726_v26 = vpop.f32.mrf.mxu2 }
 0x4f6   : > { %2336 = vmatmul.msk.bf16.gmra.mxu3 %vm737_vm5, %v1753_v37 }
 0x559   : > { %v1789_v29 = vpop.f32.mrf.mxu3 }
 0x55a   : > { %v1803_v47 = vadd.f32 %v1789_v29, %v1661_v31 }
 0x55c   : > { %v1808_v43 = vmax.f32 %v1803_v47, 0.0 }
 0x561   : > { %v1791_v40 = vpop.f32.mrf.mxu3 }
 0x562   : > { %v1804_v33 = vadd.f32 %v1791_v40, %v1662_v57 }
 0x564   : > { %v1809_v4 = vmax.f32 %v1804_v33, 0.0 }
 0x566   : > { %v1816_v48 = vrot.slane %v1809_v4, 1 }
 0x569   : > { %v1794_v62 = vpop.f32.mrf.mxu3 }
 0x56a   : > { %v1805_v45 = vadd.f32 %v1794_v62, %v1663_v9 }
 0x56c   : > { %v1810_v39 = vmax.f32 %v1805_v45, 0.0 }
 0x56e   : > { %v1817_v55 = vrot.slane %v1810_v39, 1 }
 0x570   : > { %v1818_v15 = vsel %vm1815_vm6, %v1816_v48, %v1817_v55  ;;  %v1822_v60 = vmax.f32 %v1809_v4, %v1817_v55 }
 0x571   : > { %v1796_v54 = vpop.f32.mrf.mxu3  ;;  %v1821_v0 = vmax.f32 %v1808_v43, %v1818_v15 }
 0x572   : > { %v1806_v28 = vadd.f32 %v1796_v54, %v1664_v16 }
 0x574   : > { %v1811_v1 = vmax.f32 %v1806_v28, 0.0 }
 0x576   : > { %v1825_v8 = vrot.slane %v1811_v1, 1 }
 0x579   : > { %v1799_v42 = vpop.f32.mrf.mxu3 }
 0x57a   : > { %v1807_v38 = vadd.f32 %v1799_v42, %v1665_v34 }
 0x57c   : > { %v1812_v6 = vmax.f32 %v1807_v38, 0.0 }
 0x57e   : > { %v1826_v10 = vrot.slane %v1812_v6, 1 }
 0x580   : > { %v1827_v58 = vsel %vm1815_vm6, %v1825_v8, %v1826_v10  ;;  %v1831_v3 = vmax.f32 %v1811_v1, %v1826_v10 }
 0x581   : > { %v1830_v18 = vmax.f32 %v1810_v39, %v1827_v58  ;;  %v1801_v50 = vpop.f32.mrf.mxu3 }
 0x582   : > { %v1835_v19 = vrot.slane %v1831_v3, 2 }
 0x583   : > { %v1834_v24 = vrot.slane %v1830_v18, 2 }
 0x584   : > { %v1840_v53 = vmax.f32 %v1822_v60, %v1835_v19 }
 0x585   : > { %v1836_v21 = vsel %vm419_vm1, %v1834_v24, %v1835_v19 }
 0x586   : > { %v1839_v22 = vmax.f32 %v1821_v0, %v1836_v21  ;;  %v1843_v23 = vsel %vm1842_vm7, %v1840_v53, 0.0 }
 0x588   : > { %v1841_v13 = vsel %vm737_vm5, %v1839_v22, 0.0 }
 0x589   : > { %v1844_v27 = vadd.f32 %v1843_v23, %v1841_v13 }
 0x58b   : > { %v1845_v51 = vrot.slane %v1844_v27, 4 }
 0x58d   : > { %v1846_v7 = vadd.f32 %v1845_v51, %v1844_v27 }
 0x58f   : > { %v1847_v12 = vrot.slane %v1846_v7, 2 }
 0x591   : > { %v1848_v11 = vadd.f32 %v1847_v12, %v1846_v7 }
 0x593   : > { %v1849_v31 = vrot.slane %v1848_v11, 1 }
 0x595   : > { %v1850_v32 = vadd.f32 %v1849_v31, %v1848_v11 }
 0x597   : > { %v1851_v17 = vmul.f32 0.11111111, %v1850_v32 }
 0x599   : > { %v1853_v57 = vmul.f32 %v1852_v14, %v1851_v17 }
 0x59b   : > { %v1854_v49 = vsel %vm1842_vm7, %v1853_v57, 0.0 }
 0x59c   : > { %1855 = vadd.xlane.f32.xlu0 %v1854_v49 }
 0x60f   : > { %v1856_v56 = vpop.xlane.xlu0 %1855 }
 0x610   : > { %v1858_v61 = vadd.f32 %v1857_v52, %v1856_v56 }
 0x612   : > { %1860 = vst.msk [vmem:[%s249_s11] sm:$0x1] %vm1859_vm8, %v1858_v61 }
 0x613 PF: > { %s18_s23 = sadd.s32 1, %s2428_s23  }
 0x614   : > { %p15_p4 = scmp.ge.s32.totalorder %s18_s23, 4  }
 0x616   :  { %17 = sbr.rel (!%p15_p4) target bundleno = 3 (0x3), region = 90 }

</bundles_post_ra>
